<compile_context>
chip_gen: v7x
topology: tpu7x:2x2x1
jax: 0.10.0
libtpu: 0.0.40
codegen_flags: <defaults>
</compile_context>

<pallas_src>
import functools

import numpy as np
import jax
import jax.numpy as jnp
from jax import lax
from jax.experimental import pallas as pl
from jax.experimental.pallas import tpu as pltpu


# -----------------------------------------------------------------------------
# Constant shift/mask matrix for a 3x3 "same" convolution on an H x W image
# flattened to H*W.  S[q, t*HW + p] = 1  iff tap t (= ky*3 + kx) of the output
# position p reads input position q (and that tap is inside the image).
# Out-of-image taps simply have an all-zero column -> implicit zero padding.
# -----------------------------------------------------------------------------
def _build_shift_matrix(H, W):
    HW = H * W
    S = np.zeros((HW, 9 * HW), np.float32)
    for ky in range(3):
        for kx in range(3):
            t = ky * 3 + kx
            for y in range(H):
                yy = y + ky - 1
                if not (0 <= yy < H):
                    continue
                for x in range(W):
                    xx = x + kx - 1
                    if not (0 <= xx < W):
                        continue
                    S[yy * W + xx, t * HW + (y * W + x)] = 1.0
    return S


# -----------------------------------------------------------------------------
# Fused forward kernel: one batch element per grid step, everything in VMEM.
# -----------------------------------------------------------------------------
def fused_forward_kernel(x_ref, s_ref,
                         wc1_ref, bc1_ref, wc2_ref, bc2_ref, wc3_ref, bc3_ref,
                         wl1_ref, bl1_ref, wl2_ref, bl2_ref,
                         o_ref, *, hw):
    """x_ref: (1, 1, HW); s_ref: (HW, 9*HW); wc*: (9, Cout, Cin); bc*: (Cout, 1);
    wl1_ref: (C2, HW, 128); bl1: (1, 128); wl2: (128, O); bl2: (1, O);
    o_ref: (1, 1, O)."""

    def conv3x3_relu(a, w_ref, b_ref):
        # a: (Cin, HW) lane-dense activation.
        cout = w_ref.shape[1]
        # im2col for all 9 taps in one matmul: (Cin, HW) @ (HW, 9*HW).
        wide = jnp.dot(a, s_ref[...], preferred_element_type=jnp.float32)
        acc = jnp.zeros((cout, hw), jnp.float32)
        for t in range(9):  # lane-aligned slices (multiples of HW=128)
            tap = wide[:, t * hw:(t + 1) * hw]              # (Cin, HW)
            acc = acc + jnp.dot(w_ref[t], tap,
                                preferred_element_type=jnp.float32)
        return jnp.maximum(acc + b_ref[...], 0.0)            # (Cout, HW)

    a1 = conv3x3_relu(x_ref[0], wc1_ref, bc1_ref)            # (C0, HW)
    a2 = conv3x3_relu(a1, wc2_ref, bc2_ref)                  # (C1, HW)
    a3 = conv3x3_relu(a2, wc3_ref, bc3_ref)                  # (C2, HW)

    # Flatten: (C2, HW) row-major == PyTorch NCHW flatten order, so linear1 is
    # just a sum of per-channel (1, HW) @ (HW, 128) matmuls.
    c2 = a3.shape[0]
    n_hidden = wl1_ref.shape[2]
    h = jnp.zeros((1, n_hidden), jnp.float32)
    for c in range(c2):
        h = h + jnp.dot(a3[c:c + 1, :], wl1_ref[c],
                        preferred_element_type=jnp.float32)
    h = jnp.maximum(h + bl1_ref[...], 0.0)                   # (1, 128)

    o_ref[0] = (jnp.dot(h, wl2_ref[...], preferred_element_type=jnp.float32)
                + bl2_ref[...])                              # (1, O)


# -----------------------------------------------------------------------------
# Wrapper: single pallas_call over the batch.
# -----------------------------------------------------------------------------
@jax.jit
def model_forward(x, packed):
    """x: (B, seq_len, feature_size) float32 -> (B, output_size)."""
    B, H, W = x.shape
    HW = H * W
    O = packed["wl2"].shape[1]

    # (B, H, W) -> (B, 1, HW): contiguous reshape, no data movement.
    x3 = x.reshape(B, 1, HW)

    kernel = functools.partial(fused_forward_kernel, hw=HW)

    out = pl.pallas_call(
        kernel,
        out_shape=jax.ShapeDtypeStruct((B, 1, O), jnp.float32),
        grid_spec=pltpu.PrefetchScalarGridSpec(
            num_scalar_prefetch=0,
            grid=(B,),
            in_specs=[
                pl.BlockSpec((1, 1, HW), lambda b: (b, 0, 0)),          # x
                pl.BlockSpec(packed["shift"].shape, lambda b: (0, 0)),  # S
                pl.BlockSpec(packed["wc1"].shape, lambda b: (0, 0, 0)),
                pl.BlockSpec(packed["bc1"].shape, lambda b: (0, 0)),
                pl.BlockSpec(packed["wc2"].shape, lambda b: (0, 0, 0)),
                pl.BlockSpec(packed["bc2"].shape, lambda b: (0, 0)),
                pl.BlockSpec(packed["wc3"].shape, lambda b: (0, 0, 0)),
                pl.BlockSpec(packed["bc3"].shape, lambda b: (0, 0)),
                pl.BlockSpec(packed["wl1r"].shape, lambda b: (0, 0, 0)),
                pl.BlockSpec(packed["bl1"].shape, lambda b: (0, 0)),
                pl.BlockSpec(packed["wl2"].shape, lambda b: (0, 0)),
                pl.BlockSpec(packed["bl2"].shape, lambda b: (0, 0)),
            ],
            out_specs=pl.BlockSpec((1, 1, O), lambda b: (b, 0, 0)),
        ),
        compiler_params=pltpu.CompilerParams(
            dimension_semantics=("parallel",)),
    )(x3, packed["shift"],
      packed["wc1"], packed["bc1"], packed["wc2"], packed["bc2"],
      packed["wc3"], packed["bc3"],
      packed["wl1r"], packed["bl1"], packed["wl2"], packed["bl2"])

    return out.reshape(B, O)


# -----------------------------------------------------------------------------
# Parameter init (PyTorch-native layouts) + one-time packing for the kernel.
# -----------------------------------------------------------------------------
def init_params(key, feature_size, seq_len, out_channels, output_size):
    ks = jax.random.split(key, 10)
    c0, c1, c2 = out_channels
    flat = c2 * seq_len * feature_size

    def conv_w(k, cout, cin):   # PyTorch layout (Cout, Cin, 3, 3)
        return jax.random.normal(k, (cout, cin, 3, 3), jnp.float32) * 0.1

    def lin_w(k, out_f, in_f):  # PyTorch layout (out, in)
        return jax.random.normal(k, (out_f, in_f), jnp.float32) * 0.05

    return {
        "w_c1": conv_w(ks[0], c0, 1),
        "b_c1": jax.random.normal(ks[1], (c0,), jnp.float32) * 0.1,
        "w_c2": conv_w(ks[2], c1, c0),
        "b_c2": jax.random.normal(ks[3], (c1,), jnp.float32) * 0.1,
        "w_c3": conv_w(ks[4], c2, c1),
        "b_c3": jax.random.normal(ks[5], (c2,), jnp.float32) * 0.1,
        "w_l1": lin_w(ks[6], 128, flat),
        "b_l1": jax.random.normal(ks[7], (128,), jnp.float32) * 0.05,
        "w_l2": lin_w(ks[8], output_size, 128),
        "b_l2": jax.random.normal(ks[9], (output_size,), jnp.float32) * 0.05,
    }


def pack_params(params, H, W):
    """One-time re-layout of PyTorch-shaped params for the fused kernel."""
    HW = H * W

    def pack_conv(w):  # (Cout, Cin, 3, 3) -> (9, Cout, Cin), t = ky*3 + kx
        cout, cin = w.shape[0], w.shape[1]
        return jnp.transpose(w, (2, 3, 0, 1)).reshape(9, cout, cin)

    c2 = params["w_c3"].shape[0]
    n_hidden = params["w_l1"].shape[0]
    out_dim = params["w_l2"].shape[0]

    return {
        "shift": jnp.asarray(_build_shift_matrix(H, W)),          # (HW, 9*HW)
        "wc1": pack_conv(params["w_c1"]),
        "bc1": params["b_c1"].reshape(-1, 1),
        "wc2": pack_conv(params["w_c2"]),
        "bc2": params["b_c2"].reshape(-1, 1),
        "wc3": pack_conv(params["w_c3"]),
        "bc3": params["b_c3"].reshape(-1, 1),
        # (128, F) -> (F, 128) -> (C2, HW, 128): folds NCHW flatten order in.
        "wl1r": jnp.transpose(params["w_l1"]).reshape(c2, HW, n_hidden),
        "bl1": params["b_l1"].reshape(1, n_hidden),
        "wl2": jnp.transpose(params["w_l2"]),                     # (128, O)
        "bl2": params["b_l2"].reshape(1, out_dim),
    }


# -----------------------------------------------------------------------------
# Pure-JAX reference (PyTorch semantics) for the correctness check.
# -----------------------------------------------------------------------------
def reference_forward(x, params):
    B = x.shape[0]
    h = x[:, None, :, :]  # (B, 1, H, W)

    def conv(h, w, b):
        y = lax.conv_general_dilated(
            h, w, window_strides=(1, 1), padding="SAME",
            dimension_numbers=("NCHW", "OIHW", "NCHW"))
        return jnp.maximum(y + b[None, :, None, None], 0.0)

    h = conv(h, params["w_c1"], params["b_c1"])
    h = conv(h, params["w_c2"], params["b_c2"])
    h = conv(h, params["w_c3"], params["b_c3"])
    h = h.reshape(B, -1)                                   # NCHW flatten
    h = jnp.maximum(h @ params["w_l1"].T + params["b_l1"], 0.0)
    return h @ params["w_l2"].T + params["b_l2"]


if __name__ == "__main__":
    # Small shapes consistent with the module's forward; seq_len*feature_size
    # = 128 so the spatial axis exactly fills the 128-wide lane dimension.
    batch = 2
    seq_len = 8          # H
    feature_size = 16    # W
    out_channels = (4, 8, 8)
    output_size = 10

    key = jax.random.PRNGKey(0)
    kx, kp = jax.random.split(key)
    x = jax.random.normal(kx, (batch, seq_len, feature_size), jnp.float32)
    params = init_params(kp, feature_size, seq_len, out_channels, output_size)
    packed = pack_params(params, seq_len, feature_size)

    out = model_forward(x, packed)
    out = jax.block_until_ready(out)

    ref = reference_forward(x, params)
    assert out.shape == (batch, output_size)
    max_diff = float(jnp.max(jnp.abs(out - ref)))
    assert jnp.allclose(out, ref, atol=2e-3, rtol=2e-3), (
        f"max abs diff {max_diff}")

    print("KERNEL_OK")
</pallas_src>

<mosaic_0001>
module attributes {stable_mosaic.version = 11 : i64} {
  func.func @fused_forward_kernel(%arg0: i32, %arg1: memref<1x1x128xf32, #tpu.memory_space<vmem>>, %arg2: memref<128x1152xf32, #tpu.memory_space<vmem>>, %arg3: memref<9x4x1xf32, #tpu.memory_space<vmem>>, %arg4: memref<4x1xf32, #tpu.memory_space<vmem>>, %arg5: memref<9x8x4xf32, #tpu.memory_space<vmem>>, %arg6: memref<8x1xf32, #tpu.memory_space<vmem>>, %arg7: memref<9x8x8xf32, #tpu.memory_space<vmem>>, %arg8: memref<8x1xf32, #tpu.memory_space<vmem>>, %arg9: memref<8x128x128xf32, #tpu.memory_space<vmem>>, %arg10: memref<1x128xf32, #tpu.memory_space<vmem>>, %arg11: memref<128x10xf32, #tpu.memory_space<vmem>>, %arg12: memref<1x10xf32, #tpu.memory_space<vmem>>, %arg13: memref<1x1x10xf32, #tpu.memory_space<vmem>>) attributes {dimension_semantics = [#tpu.dimension_semantics<parallel>], iteration_bounds = array<i64: 2>, scalar_prefetch = 0 : i64, scratch_operands = 0 : i64, tpu.core_type = #tpu.core_type<tc>, window_params = [{transform_indices = @transform_0, window_bounds = array<i64: 1, 1, 128>}, {pipeline_mode = #tpu.pipeline_mode<synchronous>, transform_indices = @transform_1, window_bounds = array<i64: 128, 1152>}, {pipeline_mode = #tpu.pipeline_mode<synchronous>, transform_indices = @transform_2, window_bounds = array<i64: 9, 4, 1>}, {pipeline_mode = #tpu.pipeline_mode<synchronous>, transform_indices = @transform_3, window_bounds = array<i64: 4, 1>}, {pipeline_mode = #tpu.pipeline_mode<synchronous>, transform_indices = @transform_4, window_bounds = array<i64: 9, 8, 4>}, {pipeline_mode = #tpu.pipeline_mode<synchronous>, transform_indices = @transform_5, window_bounds = array<i64: 8, 1>}, {pipeline_mode = #tpu.pipeline_mode<synchronous>, transform_indices = @transform_6, window_bounds = array<i64: 9, 8, 8>}, {pipeline_mode = #tpu.pipeline_mode<synchronous>, transform_indices = @transform_7, window_bounds = array<i64: 8, 1>}, {pipeline_mode = #tpu.pipeline_mode<synchronous>, transform_indices = @transform_8, window_bounds = array<i64: 8, 128, 128>}, {pipeline_mode = #tpu.pipeline_mode<synchronous>, transform_indices = @transform_9, window_bounds = array<i64: 1, 128>}, {pipeline_mode = #tpu.pipeline_mode<synchronous>, transform_indices = @transform_10, window_bounds = array<i64: 128, 10>}, {pipeline_mode = #tpu.pipeline_mode<synchronous>, transform_indices = @transform_11, window_bounds = array<i64: 1, 10>}, {transform_indices = @transform_12, window_bounds = array<i64: 1, 1, 10>}]} {
    %c0 = arith.constant 0 : index
    %c0_0 = arith.constant 0 : index
    %c0_1 = arith.constant 0 : index
    %0 = vector.load %arg1[%c0, %c0_0, %c0_1] : memref<1x1x128xf32, #tpu.memory_space<vmem>>, vector<1x1x128xf32>
    %1 = vector.shape_cast %0 : vector<1x1x128xf32> to vector<1x128xf32>
    %c0_2 = arith.constant 0 : index
    %c0_3 = arith.constant 0 : index
    %2 = vector.load %arg2[%c0_2, %c0_3] : memref<128x1152xf32, #tpu.memory_space<vmem>>, vector<128x1152xf32>
    %cst = arith.constant dense<0.000000e+00> : vector<1x1152xf32>
    %3 = tpu.matmul %1, %2, %cst {dimension_numbers = #tpu.dot_dimension_numbers<[1], [0], [0], [1], [0, 0, 1, 1], [], []>} : vector<1x128xf32>, vector<128x1152xf32>, vector<1x1152xf32> -> vector<1x1152xf32>
    %cst_4 = arith.constant 0.000000e+00 : f32
    %4 = vector.broadcast %cst_4 : f32 to vector<4x128xf32>
    %5 = vector.extract_strided_slice %3 {offsets = [0, 0], sizes = [1, 128], strides = [1, 1]} : vector<1x1152xf32> to vector<1x128xf32>
    %c0_5 = arith.constant 0 : index
    %c0_6 = arith.constant 0 : index
    %c0_7 = arith.constant 0 : index
    %6 = vector.load %arg3[%c0_5, %c0_6, %c0_7] : memref<9x4x1xf32, #tpu.memory_space<vmem>>, vector<1x4x1xf32>
    %7 = vector.shape_cast %6 : vector<1x4x1xf32> to vector<4x1xf32>
    %cst_8 = arith.constant dense<0.000000e+00> : vector<4x128xf32>
    %8 = tpu.matmul %7, %5, %cst_8 {dimension_numbers = #tpu.dot_dimension_numbers<[1], [0], [0], [1], [0, 0, 1, 1], [], []>} : vector<4x1xf32>, vector<1x128xf32>, vector<4x128xf32> -> vector<4x128xf32>
    %9 = arith.addf %4, %8 : vector<4x128xf32>
    %10 = vector.extract_strided_slice %3 {offsets = [0, 128], sizes = [1, 128], strides = [1, 1]} : vector<1x1152xf32> to vector<1x128xf32>
    %c1 = arith.constant 1 : index
    %c0_9 = arith.constant 0 : index
    %c0_10 = arith.constant 0 : index
    %11 = vector.load %arg3[%c1, %c0_9, %c0_10] : memref<9x4x1xf32, #tpu.memory_space<vmem>>, vector<1x4x1xf32>
    %12 = vector.shape_cast %11 : vector<1x4x1xf32> to vector<4x1xf32>
    %cst_11 = arith.constant dense<0.000000e+00> : vector<4x128xf32>
    %13 = tpu.matmul %12, %10, %cst_11 {dimension_numbers = #tpu.dot_dimension_numbers<[1], [0], [0], [1], [0, 0, 1, 1], [], []>} : vector<4x1xf32>, vector<1x128xf32>, vector<4x128xf32> -> vector<4x128xf32>
    %14 = arith.addf %9, %13 : vector<4x128xf32>
    %15 = vector.extract_strided_slice %3 {offsets = [0, 256], sizes = [1, 128], strides = [1, 1]} : vector<1x1152xf32> to vector<1x128xf32>
    %c2 = arith.constant 2 : index
    %c0_12 = arith.constant 0 : index
    %c0_13 = arith.constant 0 : index
    %16 = vector.load %arg3[%c2, %c0_12, %c0_13] : memref<9x4x1xf32, #tpu.memory_space<vmem>>, vector<1x4x1xf32>
    %17 = vector.shape_cast %16 : vector<1x4x1xf32> to vector<4x1xf32>
    %cst_14 = arith.constant dense<0.000000e+00> : vector<4x128xf32>
    %18 = tpu.matmul %17, %15, %cst_14 {dimension_numbers = #tpu.dot_dimension_numbers<[1], [0], [0], [1], [0, 0, 1, 1], [], []>} : vector<4x1xf32>, vector<1x128xf32>, vector<4x128xf32> -> vector<4x128xf32>
    %19 = arith.addf %14, %18 : vector<4x128xf32>
    %20 = vector.extract_strided_slice %3 {offsets = [0, 384], sizes = [1, 128], strides = [1, 1]} : vector<1x1152xf32> to vector<1x128xf32>
    %c3 = arith.constant 3 : index
    %c0_15 = arith.constant 0 : index
    %c0_16 = arith.constant 0 : index
    %21 = vector.load %arg3[%c3, %c0_15, %c0_16] : memref<9x4x1xf32, #tpu.memory_space<vmem>>, vector<1x4x1xf32>
    %22 = vector.shape_cast %21 : vector<1x4x1xf32> to vector<4x1xf32>
    %cst_17 = arith.constant dense<0.000000e+00> : vector<4x128xf32>
    %23 = tpu.matmul %22, %20, %cst_17 {dimension_numbers = #tpu.dot_dimension_numbers<[1], [0], [0], [1], [0, 0, 1, 1], [], []>} : vector<4x1xf32>, vector<1x128xf32>, vector<4x128xf32> -> vector<4x128xf32>
    %24 = arith.addf %19, %23 : vector<4x128xf32>
    %25 = vector.extract_strided_slice %3 {offsets = [0, 512], sizes = [1, 128], strides = [1, 1]} : vector<1x1152xf32> to vector<1x128xf32>
    %c4 = arith.constant 4 : index
    %c0_18 = arith.constant 0 : index
    %c0_19 = arith.constant 0 : index
    %26 = vector.load %arg3[%c4, %c0_18, %c0_19] : memref<9x4x1xf32, #tpu.memory_space<vmem>>, vector<1x4x1xf32>
    %27 = vector.shape_cast %26 : vector<1x4x1xf32> to vector<4x1xf32>
    %cst_20 = arith.constant dense<0.000000e+00> : vector<4x128xf32>
    %28 = tpu.matmul %27, %25, %cst_20 {dimension_numbers = #tpu.dot_dimension_numbers<[1], [0], [0], [1], [0, 0, 1, 1], [], []>} : vector<4x1xf32>, vector<1x128xf32>, vector<4x128xf32> -> vector<4x128xf32>
    %29 = arith.addf %24, %28 : vector<4x128xf32>
    %30 = vector.extract_strided_slice %3 {offsets = [0, 640], sizes = [1, 128], strides = [1, 1]} : vector<1x1152xf32> to vector<1x128xf32>
    %c5 = arith.constant 5 : index
    %c0_21 = arith.constant 0 : index
    %c0_22 = arith.constant 0 : index
    %31 = vector.load %arg3[%c5, %c0_21, %c0_22] : memref<9x4x1xf32, #tpu.memory_space<vmem>>, vector<1x4x1xf32>
    %32 = vector.shape_cast %31 : vector<1x4x1xf32> to vector<4x1xf32>
    %cst_23 = arith.constant dense<0.000000e+00> : vector<4x128xf32>
    %33 = tpu.matmul %32, %30, %cst_23 {dimension_numbers = #tpu.dot_dimension_numbers<[1], [0], [0], [1], [0, 0, 1, 1], [], []>} : vector<4x1xf32>, vector<1x128xf32>, vector<4x128xf32> -> vector<4x128xf32>
    %34 = arith.addf %29, %33 : vector<4x128xf32>
    %35 = vector.extract_strided_slice %3 {offsets = [0, 768], sizes = [1, 128], strides = [1, 1]} : vector<1x1152xf32> to vector<1x128xf32>
    %c6 = arith.constant 6 : index
    %c0_24 = arith.constant 0 : index
    %c0_25 = arith.constant 0 : index
    %36 = vector.load %arg3[%c6, %c0_24, %c0_25] : memref<9x4x1xf32, #tpu.memory_space<vmem>>, vector<1x4x1xf32>
    %37 = vector.shape_cast %36 : vector<1x4x1xf32> to vector<4x1xf32>
    %cst_26 = arith.constant dense<0.000000e+00> : vector<4x128xf32>
    %38 = tpu.matmul %37, %35, %cst_26 {dimension_numbers = #tpu.dot_dimension_numbers<[1], [0], [0], [1], [0, 0, 1, 1], [], []>} : vector<4x1xf32>, vector<1x128xf32>, vector<4x128xf32> -> vector<4x128xf32>
    %39 = arith.addf %34, %38 : vector<4x128xf32>
    %40 = vector.extract_strided_slice %3 {offsets = [0, 896], sizes = [1, 128], strides = [1, 1]} : vector<1x1152xf32> to vector<1x128xf32>
    %c7 = arith.constant 7 : index
    %c0_27 = arith.constant 0 : index
    %c0_28 = arith.constant 0 : index
    %41 = vector.load %arg3[%c7, %c0_27, %c0_28] : memref<9x4x1xf32, #tpu.memory_space<vmem>>, vector<1x4x1xf32>
    %42 = vector.shape_cast %41 : vector<1x4x1xf32> to vector<4x1xf32>
    %cst_29 = arith.constant dense<0.000000e+00> : vector<4x128xf32>
    %43 = tpu.matmul %42, %40, %cst_29 {dimension_numbers = #tpu.dot_dimension_numbers<[1], [0], [0], [1], [0, 0, 1, 1], [], []>} : vector<4x1xf32>, vector<1x128xf32>, vector<4x128xf32> -> vector<4x128xf32>
    %44 = arith.addf %39, %43 : vector<4x128xf32>
    %45 = vector.extract_strided_slice %3 {offsets = [0, 1024], sizes = [1, 128], strides = [1, 1]} : vector<1x1152xf32> to vector<1x128xf32>
    %c8 = arith.constant 8 : index
    %c0_30 = arith.constant 0 : index
    %c0_31 = arith.constant 0 : index
    %46 = vector.load %arg3[%c8, %c0_30, %c0_31] : memref<9x4x1xf32, #tpu.memory_space<vmem>>, vector<1x4x1xf32>
    %47 = vector.shape_cast %46 : vector<1x4x1xf32> to vector<4x1xf32>
    %cst_32 = arith.constant dense<0.000000e+00> : vector<4x128xf32>
    %48 = tpu.matmul %47, %45, %cst_32 {dimension_numbers = #tpu.dot_dimension_numbers<[1], [0], [0], [1], [0, 0, 1, 1], [], []>} : vector<4x1xf32>, vector<1x128xf32>, vector<4x128xf32> -> vector<4x128xf32>
    %49 = arith.addf %44, %48 : vector<4x128xf32>
    %c0_33 = arith.constant 0 : index
    %c0_34 = arith.constant 0 : index
    %50 = vector.load %arg4[%c0_33, %c0_34] : memref<4x1xf32, #tpu.memory_space<vmem>>, vector<4x1xf32>
    %51 = vector.broadcast %50 : vector<4x1xf32> to vector<4x128xf32>
    %52 = arith.addf %49, %51 : vector<4x128xf32>
    %cst_35 = arith.constant 0.000000e+00 : f32
    %53 = vector.broadcast %cst_35 : f32 to vector<4x128xf32>
    %54 = arith.maximumf %52, %53 : vector<4x128xf32>
    %c0_36 = arith.constant 0 : index
    %c0_37 = arith.constant 0 : index
    %55 = vector.load %arg2[%c0_36, %c0_37] : memref<128x1152xf32, #tpu.memory_space<vmem>>, vector<128x1152xf32>
    %cst_38 = arith.constant dense<0.000000e+00> : vector<4x1152xf32>
    %56 = tpu.matmul %54, %55, %cst_38 {dimension_numbers = #tpu.dot_dimension_numbers<[1], [0], [0], [1], [0, 0, 1, 1], [], []>} : vector<4x128xf32>, vector<128x1152xf32>, vector<4x1152xf32> -> vector<4x1152xf32>
    %cst_39 = arith.constant 0.000000e+00 : f32
    %57 = vector.broadcast %cst_39 : f32 to vector<8x128xf32>
    %58 = vector.extract_strided_slice %56 {offsets = [0, 0], sizes = [4, 128], strides = [1, 1]} : vector<4x1152xf32> to vector<4x128xf32>
    %c0_40 = arith.constant 0 : index
    %c0_41 = arith.constant 0 : index
    %c0_42 = arith.constant 0 : index
    %59 = vector.load %arg5[%c0_40, %c0_41, %c0_42] : memref<9x8x4xf32, #tpu.memory_space<vmem>>, vector<1x8x4xf32>
    %60 = vector.shape_cast %59 : vector<1x8x4xf32> to vector<8x4xf32>
    %cst_43 = arith.constant dense<0.000000e+00> : vector<8x128xf32>
    %61 = tpu.matmul %60, %58, %cst_43 {dimension_numbers = #tpu.dot_dimension_numbers<[1], [0], [0], [1], [0, 0, 1, 1], [], []>} : vector<8x4xf32>, vector<4x128xf32>, vector<8x128xf32> -> vector<8x128xf32>
    %62 = arith.addf %57, %61 : vector<8x128xf32>
    %63 = vector.extract_strided_slice %56 {offsets = [0, 128], sizes = [4, 128], strides = [1, 1]} : vector<4x1152xf32> to vector<4x128xf32>
    %c1_44 = arith.constant 1 : index
    %c0_45 = arith.constant 0 : index
    %c0_46 = arith.constant 0 : index
    %64 = vector.load %arg5[%c1_44, %c0_45, %c0_46] : memref<9x8x4xf32, #tpu.memory_space<vmem>>, vector<1x8x4xf32>
    %65 = vector.shape_cast %64 : vector<1x8x4xf32> to vector<8x4xf32>
    %cst_47 = arith.constant dense<0.000000e+00> : vector<8x128xf32>
    %66 = tpu.matmul %65, %63, %cst_47 {dimension_numbers = #tpu.dot_dimension_numbers<[1], [0], [0], [1], [0, 0, 1, 1], [], []>} : vector<8x4xf32>, vector<4x128xf32>, vector<8x128xf32> -> vector<8x128xf32>
    %67 = arith.addf %62, %66 : vector<8x128xf32>
    %68 = vector.extract_strided_slice %56 {offsets = [0, 256], sizes = [4, 128], strides = [1, 1]} : vector<4x1152xf32> to vector<4x128xf32>
    %c2_48 = arith.constant 2 : index
    %c0_49 = arith.constant 0 : index
    %c0_50 = arith.constant 0 : index
    %69 = vector.load %arg5[%c2_48, %c0_49, %c0_50] : memref<9x8x4xf32, #tpu.memory_space<vmem>>, vector<1x8x4xf32>
    %70 = vector.shape_cast %69 : vector<1x8x4xf32> to vector<8x4xf32>
    %cst_51 = arith.constant dense<0.000000e+00> : vector<8x128xf32>
    %71 = tpu.matmul %70, %68, %cst_51 {dimension_numbers = #tpu.dot_dimension_numbers<[1], [0], [0], [1], [0, 0, 1, 1], [], []>} : vector<8x4xf32>, vector<4x128xf32>, vector<8x128xf32> -> vector<8x128xf32>
    %72 = arith.addf %67, %71 : vector<8x128xf32>
    %73 = vector.extract_strided_slice %56 {offsets = [0, 384], sizes = [4, 128], strides = [1, 1]} : vector<4x1152xf32> to vector<4x128xf32>
    %c3_52 = arith.constant 3 : index
    %c0_53 = arith.constant 0 : index
    %c0_54 = arith.constant 0 : index
    %74 = vector.load %arg5[%c3_52, %c0_53, %c0_54] : memref<9x8x4xf32, #tpu.memory_space<vmem>>, vector<1x8x4xf32>
    %75 = vector.shape_cast %74 : vector<1x8x4xf32> to vector<8x4xf32>
    %cst_55 = arith.constant dense<0.000000e+00> : vector<8x128xf32>
    %76 = tpu.matmul %75, %73, %cst_55 {dimension_numbers = #tpu.dot_dimension_numbers<[1], [0], [0], [1], [0, 0, 1, 1], [], []>} : vector<8x4xf32>, vector<4x128xf32>, vector<8x128xf32> -> vector<8x128xf32>
    %77 = arith.addf %72, %76 : vector<8x128xf32>
    %78 = vector.extract_strided_slice %56 {offsets = [0, 512], sizes = [4, 128], strides = [1, 1]} : vector<4x1152xf32> to vector<4x128xf32>
    %c4_56 = arith.constant 4 : index
    %c0_57 = arith.constant 0 : index
    %c0_58 = arith.constant 0 : index
    %79 = vector.load %arg5[%c4_56, %c0_57, %c0_58] : memref<9x8x4xf32, #tpu.memory_space<vmem>>, vector<1x8x4xf32>
    %80 = vector.shape_cast %79 : vector<1x8x4xf32> to vector<8x4xf32>
    %cst_59 = arith.constant dense<0.000000e+00> : vector<8x128xf32>
    %81 = tpu.matmul %80, %78, %cst_59 {dimension_numbers = #tpu.dot_dimension_numbers<[1], [0], [0], [1], [0, 0, 1, 1], [], []>} : vector<8x4xf32>, vector<4x128xf32>, vector<8x128xf32> -> vector<8x128xf32>
    %82 = arith.addf %77, %81 : vector<8x128xf32>
    %83 = vector.extract_strided_slice %56 {offsets = [0, 640], sizes = [4, 128], strides = [1, 1]} : vector<4x1152xf32> to vector<4x128xf32>
    %c5_60 = arith.constant 5 : index
    %c0_61 = arith.constant 0 : index
    %c0_62 = arith.constant 0 : index
    %84 = vector.load %arg5[%c5_60, %c0_61, %c0_62] : memref<9x8x4xf32, #tpu.memory_space<vmem>>, vector<1x8x4xf32>
    %85 = vector.shape_cast %84 : vector<1x8x4xf32> to vector<8x4xf32>
    %cst_63 = arith.constant dense<0.000000e+00> : vector<8x128xf32>
    %86 = tpu.matmul %85, %83, %cst_63 {dimension_numbers = #tpu.dot_dimension_numbers<[1], [0], [0], [1], [0, 0, 1, 1], [], []>} : vector<8x4xf32>, vector<4x128xf32>, vector<8x128xf32> -> vector<8x128xf32>
    %87 = arith.addf %82, %86 : vector<8x128xf32>
    %88 = vector.extract_strided_slice %56 {offsets = [0, 768], sizes = [4, 128], strides = [1, 1]} : vector<4x1152xf32> to vector<4x128xf32>
    %c6_64 = arith.constant 6 : index
    %c0_65 = arith.constant 0 : index
    %c0_66 = arith.constant 0 : index
    %89 = vector.load %arg5[%c6_64, %c0_65, %c0_66] : memref<9x8x4xf32, #tpu.memory_space<vmem>>, vector<1x8x4xf32>
    %90 = vector.shape_cast %89 : vector<1x8x4xf32> to vector<8x4xf32>
    %cst_67 = arith.constant dense<0.000000e+00> : vector<8x128xf32>
    %91 = tpu.matmul %90, %88, %cst_67 {dimension_numbers = #tpu.dot_dimension_numbers<[1], [0], [0], [1], [0, 0, 1, 1], [], []>} : vector<8x4xf32>, vector<4x128xf32>, vector<8x128xf32> -> vector<8x128xf32>
    %92 = arith.addf %87, %91 : vector<8x128xf32>
    %93 = vector.extract_strided_slice %56 {offsets = [0, 896], sizes = [4, 128], strides = [1, 1]} : vector<4x1152xf32> to vector<4x128xf32>
    %c7_68 = arith.constant 7 : index
    %c0_69 = arith.constant 0 : index
    %c0_70 = arith.constant 0 : index
    %94 = vector.load %arg5[%c7_68, %c0_69, %c0_70] : memref<9x8x4xf32, #tpu.memory_space<vmem>>, vector<1x8x4xf32>
    %95 = vector.shape_cast %94 : vector<1x8x4xf32> to vector<8x4xf32>
    %cst_71 = arith.constant dense<0.000000e+00> : vector<8x128xf32>
    %96 = tpu.matmul %95, %93, %cst_71 {dimension_numbers = #tpu.dot_dimension_numbers<[1], [0], [0], [1], [0, 0, 1, 1], [], []>} : vector<8x4xf32>, vector<4x128xf32>, vector<8x128xf32> -> vector<8x128xf32>
    %97 = arith.addf %92, %96 : vector<8x128xf32>
    %98 = vector.extract_strided_slice %56 {offsets = [0, 1024], sizes = [4, 128], strides = [1, 1]} : vector<4x1152xf32> to vector<4x128xf32>
    %c8_72 = arith.constant 8 : index
    %c0_73 = arith.constant 0 : index
    %c0_74 = arith.constant 0 : index
    %99 = vector.load %arg5[%c8_72, %c0_73, %c0_74] : memref<9x8x4xf32, #tpu.memory_space<vmem>>, vector<1x8x4xf32>
    %100 = vector.shape_cast %99 : vector<1x8x4xf32> to vector<8x4xf32>
    %cst_75 = arith.constant dense<0.000000e+00> : vector<8x128xf32>
    %101 = tpu.matmul %100, %98, %cst_75 {dimension_numbers = #tpu.dot_dimension_numbers<[1], [0], [0], [1], [0, 0, 1, 1], [], []>} : vector<8x4xf32>, vector<4x128xf32>, vector<8x128xf32> -> vector<8x128xf32>
    %102 = arith.addf %97, %101 : vector<8x128xf32>
    %c0_76 = arith.constant 0 : index
    %c0_77 = arith.constant 0 : index
    %103 = vector.load %arg6[%c0_76, %c0_77] : memref<8x1xf32, #tpu.memory_space<vmem>>, vector<8x1xf32>
    %104 = vector.broadcast %103 : vector<8x1xf32> to vector<8x128xf32>
    %105 = arith.addf %102, %104 : vector<8x128xf32>
    %cst_78 = arith.constant 0.000000e+00 : f32
    %106 = vector.broadcast %cst_78 : f32 to vector<8x128xf32>
    %107 = arith.maximumf %105, %106 : vector<8x128xf32>
    %c0_79 = arith.constant 0 : index
    %c0_80 = arith.constant 0 : index
    %108 = vector.load %arg2[%c0_79, %c0_80] : memref<128x1152xf32, #tpu.memory_space<vmem>>, vector<128x1152xf32>
    %cst_81 = arith.constant dense<0.000000e+00> : vector<8x1152xf32>
    %109 = tpu.matmul %107, %108, %cst_81 {dimension_numbers = #tpu.dot_dimension_numbers<[1], [0], [0], [1], [0, 0, 1, 1], [], []>} : vector<8x128xf32>, vector<128x1152xf32>, vector<8x1152xf32> -> vector<8x1152xf32>
    %cst_82 = arith.constant 0.000000e+00 : f32
    %110 = vector.broadcast %cst_82 : f32 to vector<8x128xf32>
    %111 = vector.extract_strided_slice %109 {offsets = [0, 0], sizes = [8, 128], strides = [1, 1]} : vector<8x1152xf32> to vector<8x128xf32>
    %c0_83 = arith.constant 0 : index
    %c0_84 = arith.constant 0 : index
    %c0_85 = arith.constant 0 : index
    %112 = vector.load %arg7[%c0_83, %c0_84, %c0_85] : memref<9x8x8xf32, #tpu.memory_space<vmem>>, vector<1x8x8xf32>
    %113 = vector.shape_cast %112 : vector<1x8x8xf32> to vector<8x8xf32>
    %cst_86 = arith.constant dense<0.000000e+00> : vector<8x128xf32>
    %114 = tpu.matmul %113, %111, %cst_86 {dimension_numbers = #tpu.dot_dimension_numbers<[1], [0], [0], [1], [0, 0, 1, 1], [], []>} : vector<8x8xf32>, vector<8x128xf32>, vector<8x128xf32> -> vector<8x128xf32>
    %115 = arith.addf %110, %114 : vector<8x128xf32>
    %116 = vector.extract_strided_slice %109 {offsets = [0, 128], sizes = [8, 128], strides = [1, 1]} : vector<8x1152xf32> to vector<8x128xf32>
    %c1_87 = arith.constant 1 : index
    %c0_88 = arith.constant 0 : index
    %c0_89 = arith.constant 0 : index
    %117 = vector.load %arg7[%c1_87, %c0_88, %c0_89] : memref<9x8x8xf32, #tpu.memory_space<vmem>>, vector<1x8x8xf32>
    %118 = vector.shape_cast %117 : vector<1x8x8xf32> to vector<8x8xf32>
    %cst_90 = arith.constant dense<0.000000e+00> : vector<8x128xf32>
    %119 = tpu.matmul %118, %116, %cst_90 {dimension_numbers = #tpu.dot_dimension_numbers<[1], [0], [0], [1], [0, 0, 1, 1], [], []>} : vector<8x8xf32>, vector<8x128xf32>, vector<8x128xf32> -> vector<8x128xf32>
    %120 = arith.addf %115, %119 : vector<8x128xf32>
    %121 = vector.extract_strided_slice %109 {offsets = [0, 256], sizes = [8, 128], strides = [1, 1]} : vector<8x1152xf32> to vector<8x128xf32>
    %c2_91 = arith.constant 2 : index
    %c0_92 = arith.constant 0 : index
    %c0_93 = arith.constant 0 : index
    %122 = vector.load %arg7[%c2_91, %c0_92, %c0_93] : memref<9x8x8xf32, #tpu.memory_space<vmem>>, vector<1x8x8xf32>
    %123 = vector.shape_cast %122 : vector<1x8x8xf32> to vector<8x8xf32>
    %cst_94 = arith.constant dense<0.000000e+00> : vector<8x128xf32>
    %124 = tpu.matmul %123, %121, %cst_94 {dimension_numbers = #tpu.dot_dimension_numbers<[1], [0], [0], [1], [0, 0, 1, 1], [], []>} : vector<8x8xf32>, vector<8x128xf32>, vector<8x128xf32> -> vector<8x128xf32>
    %125 = arith.addf %120, %124 : vector<8x128xf32>
    %126 = vector.extract_strided_slice %109 {offsets = [0, 384], sizes = [8, 128], strides = [1, 1]} : vector<8x1152xf32> to vector<8x128xf32>
    %c3_95 = arith.constant 3 : index
    %c0_96 = arith.constant 0 : index
    %c0_97 = arith.constant 0 : index
    %127 = vector.load %arg7[%c3_95, %c0_96, %c0_97] : memref<9x8x8xf32, #tpu.memory_space<vmem>>, vector<1x8x8xf32>
    %128 = vector.shape_cast %127 : vector<1x8x8xf32> to vector<8x8xf32>
    %cst_98 = arith.constant dense<0.000000e+00> : vector<8x128xf32>
    %129 = tpu.matmul %128, %126, %cst_98 {dimension_numbers = #tpu.dot_dimension_numbers<[1], [0], [0], [1], [0, 0, 1, 1], [], []>} : vector<8x8xf32>, vector<8x128xf32>, vector<8x128xf32> -> vector<8x128xf32>
    %130 = arith.addf %125, %129 : vector<8x128xf32>
    %131 = vector.extract_strided_slice %109 {offsets = [0, 512], sizes = [8, 128], strides = [1, 1]} : vector<8x1152xf32> to vector<8x128xf32>
    %c4_99 = arith.constant 4 : index
    %c0_100 = arith.constant 0 : index
    %c0_101 = arith.constant 0 : index
    %132 = vector.load %arg7[%c4_99, %c0_100, %c0_101] : memref<9x8x8xf32, #tpu.memory_space<vmem>>, vector<1x8x8xf32>
    %133 = vector.shape_cast %132 : vector<1x8x8xf32> to vector<8x8xf32>
    %cst_102 = arith.constant dense<0.000000e+00> : vector<8x128xf32>
    %134 = tpu.matmul %133, %131, %cst_102 {dimension_numbers = #tpu.dot_dimension_numbers<[1], [0], [0], [1], [0, 0, 1, 1], [], []>} : vector<8x8xf32>, vector<8x128xf32>, vector<8x128xf32> -> vector<8x128xf32>
    %135 = arith.addf %130, %134 : vector<8x128xf32>
    %136 = vector.extract_strided_slice %109 {offsets = [0, 640], sizes = [8, 128], strides = [1, 1]} : vector<8x1152xf32> to vector<8x128xf32>
    %c5_103 = arith.constant 5 : index
    %c0_104 = arith.constant 0 : index
    %c0_105 = arith.constant 0 : index
    %137 = vector.load %arg7[%c5_103, %c0_104, %c0_105] : memref<9x8x8xf32, #tpu.memory_space<vmem>>, vector<1x8x8xf32>
    %138 = vector.shape_cast %137 : vector<1x8x8xf32> to vector<8x8xf32>
    %cst_106 = arith.constant dense<0.000000e+00> : vector<8x128xf32>
    %139 = tpu.matmul %138, %136, %cst_106 {dimension_numbers = #tpu.dot_dimension_numbers<[1], [0], [0], [1], [0, 0, 1, 1], [], []>} : vector<8x8xf32>, vector<8x128xf32>, vector<8x128xf32> -> vector<8x128xf32>
    %140 = arith.addf %135, %139 : vector<8x128xf32>
    %141 = vector.extract_strided_slice %109 {offsets = [0, 768], sizes = [8, 128], strides = [1, 1]} : vector<8x1152xf32> to vector<8x128xf32>
    %c6_107 = arith.constant 6 : index
    %c0_108 = arith.constant 0 : index
    %c0_109 = arith.constant 0 : index
    %142 = vector.load %arg7[%c6_107, %c0_108, %c0_109] : memref<9x8x8xf32, #tpu.memory_space<vmem>>, vector<1x8x8xf32>
    %143 = vector.shape_cast %142 : vector<1x8x8xf32> to vector<8x8xf32>
    %cst_110 = arith.constant dense<0.000000e+00> : vector<8x128xf32>
    %144 = tpu.matmul %143, %141, %cst_110 {dimension_numbers = #tpu.dot_dimension_numbers<[1], [0], [0], [1], [0, 0, 1, 1], [], []>} : vector<8x8xf32>, vector<8x128xf32>, vector<8x128xf32> -> vector<8x128xf32>
    %145 = arith.addf %140, %144 : vector<8x128xf32>
    %146 = vector.extract_strided_slice %109 {offsets = [0, 896], sizes = [8, 128], strides = [1, 1]} : vector<8x1152xf32> to vector<8x128xf32>
    %c7_111 = arith.constant 7 : index
    %c0_112 = arith.constant 0 : index
    %c0_113 = arith.constant 0 : index
    %147 = vector.load %arg7[%c7_111, %c0_112, %c0_113] : memref<9x8x8xf32, #tpu.memory_space<vmem>>, vector<1x8x8xf32>
    %148 = vector.shape_cast %147 : vector<1x8x8xf32> to vector<8x8xf32>
    %cst_114 = arith.constant dense<0.000000e+00> : vector<8x128xf32>
    %149 = tpu.matmul %148, %146, %cst_114 {dimension_numbers = #tpu.dot_dimension_numbers<[1], [0], [0], [1], [0, 0, 1, 1], [], []>} : vector<8x8xf32>, vector<8x128xf32>, vector<8x128xf32> -> vector<8x128xf32>
    %150 = arith.addf %145, %149 : vector<8x128xf32>
    %151 = vector.extract_strided_slice %109 {offsets = [0, 1024], sizes = [8, 128], strides = [1, 1]} : vector<8x1152xf32> to vector<8x128xf32>
    %c8_115 = arith.constant 8 : index
    %c0_116 = arith.constant 0 : index
    %c0_117 = arith.constant 0 : index
    %152 = vector.load %arg7[%c8_115, %c0_116, %c0_117] : memref<9x8x8xf32, #tpu.memory_space<vmem>>, vector<1x8x8xf32>
    %153 = vector.shape_cast %152 : vector<1x8x8xf32> to vector<8x8xf32>
    %cst_118 = arith.constant dense<0.000000e+00> : vector<8x128xf32>
    %154 = tpu.matmul %153, %151, %cst_118 {dimension_numbers = #tpu.dot_dimension_numbers<[1], [0], [0], [1], [0, 0, 1, 1], [], []>} : vector<8x8xf32>, vector<8x128xf32>, vector<8x128xf32> -> vector<8x128xf32>
    %155 = arith.addf %150, %154 : vector<8x128xf32>
    %c0_119 = arith.constant 0 : index
    %c0_120 = arith.constant 0 : index
    %156 = vector.load %arg8[%c0_119, %c0_120] : memref<8x1xf32, #tpu.memory_space<vmem>>, vector<8x1xf32>
    %157 = vector.broadcast %156 : vector<8x1xf32> to vector<8x128xf32>
    %158 = arith.addf %155, %157 : vector<8x128xf32>
    %cst_121 = arith.constant 0.000000e+00 : f32
    %159 = vector.broadcast %cst_121 : f32 to vector<8x128xf32>
    %160 = arith.maximumf %158, %159 : vector<8x128xf32>
    %cst_122 = arith.constant 0.000000e+00 : f32
    %161 = vector.broadcast %cst_122 : f32 to vector<1x128xf32>
    %162 = vector.extract_strided_slice %160 {offsets = [0, 0], sizes = [1, 128], strides = [1, 1]} : vector<8x128xf32> to vector<1x128xf32>
    %c0_123 = arith.constant 0 : index
    %c0_124 = arith.constant 0 : index
    %c0_125 = arith.constant 0 : index
    %163 = vector.load %arg9[%c0_123, %c0_124, %c0_125] : memref<8x128x128xf32, #tpu.memory_space<vmem>>, vector<1x128x128xf32>
    %164 = vector.shape_cast %163 : vector<1x128x128xf32> to vector<128x128xf32>
    %cst_126 = arith.constant dense<0.000000e+00> : vector<1x128xf32>
    %165 = tpu.matmul %162, %164, %cst_126 {dimension_numbers = #tpu.dot_dimension_numbers<[1], [0], [0], [1], [0, 0, 1, 1], [], []>} : vector<1x128xf32>, vector<128x128xf32>, vector<1x128xf32> -> vector<1x128xf32>
    %166 = arith.addf %161, %165 : vector<1x128xf32>
    %167 = vector.extract_strided_slice %160 {offsets = [1, 0], sizes = [1, 128], strides = [1, 1]} : vector<8x128xf32> to vector<1x128xf32>
    %c1_127 = arith.constant 1 : index
    %c0_128 = arith.constant 0 : index
    %c0_129 = arith.constant 0 : index
    %168 = vector.load %arg9[%c1_127, %c0_128, %c0_129] : memref<8x128x128xf32, #tpu.memory_space<vmem>>, vector<1x128x128xf32>
    %169 = vector.shape_cast %168 : vector<1x128x128xf32> to vector<128x128xf32>
    %cst_130 = arith.constant dense<0.000000e+00> : vector<1x128xf32>
    %170 = tpu.matmul %167, %169, %cst_130 {dimension_numbers = #tpu.dot_dimension_numbers<[1], [0], [0], [1], [0, 0, 1, 1], [], []>} : vector<1x128xf32>, vector<128x128xf32>, vector<1x128xf32> -> vector<1x128xf32>
    %171 = arith.addf %166, %170 : vector<1x128xf32>
    %172 = vector.extract_strided_slice %160 {offsets = [2, 0], sizes = [1, 128], strides = [1, 1]} : vector<8x128xf32> to vector<1x128xf32>
    %c2_131 = arith.constant 2 : index
    %c0_132 = arith.constant 0 : index
    %c0_133 = arith.constant 0 : index
    %173 = vector.load %arg9[%c2_131, %c0_132, %c0_133] : memref<8x128x128xf32, #tpu.memory_space<vmem>>, vector<1x128x128xf32>
    %174 = vector.shape_cast %173 : vector<1x128x128xf32> to vector<128x128xf32>
    %cst_134 = arith.constant dense<0.000000e+00> : vector<1x128xf32>
    %175 = tpu.matmul %172, %174, %cst_134 {dimension_numbers = #tpu.dot_dimension_numbers<[1], [0], [0], [1], [0, 0, 1, 1], [], []>} : vector<1x128xf32>, vector<128x128xf32>, vector<1x128xf32> -> vector<1x128xf32>
    %176 = arith.addf %171, %175 : vector<1x128xf32>
    %177 = vector.extract_strided_slice %160 {offsets = [3, 0], sizes = [1, 128], strides = [1, 1]} : vector<8x128xf32> to vector<1x128xf32>
    %c3_135 = arith.constant 3 : index
    %c0_136 = arith.constant 0 : index
    %c0_137 = arith.constant 0 : index
    %178 = vector.load %arg9[%c3_135, %c0_136, %c0_137] : memref<8x128x128xf32, #tpu.memory_space<vmem>>, vector<1x128x128xf32>
    %179 = vector.shape_cast %178 : vector<1x128x128xf32> to vector<128x128xf32>
    %cst_138 = arith.constant dense<0.000000e+00> : vector<1x128xf32>
    %180 = tpu.matmul %177, %179, %cst_138 {dimension_numbers = #tpu.dot_dimension_numbers<[1], [0], [0], [1], [0, 0, 1, 1], [], []>} : vector<1x128xf32>, vector<128x128xf32>, vector<1x128xf32> -> vector<1x128xf32>
    %181 = arith.addf %176, %180 : vector<1x128xf32>
    %182 = vector.extract_strided_slice %160 {offsets = [4, 0], sizes = [1, 128], strides = [1, 1]} : vector<8x128xf32> to vector<1x128xf32>
    %c4_139 = arith.constant 4 : index
    %c0_140 = arith.constant 0 : index
    %c0_141 = arith.constant 0 : index
    %183 = vector.load %arg9[%c4_139, %c0_140, %c0_141] : memref<8x128x128xf32, #tpu.memory_space<vmem>>, vector<1x128x128xf32>
    %184 = vector.shape_cast %183 : vector<1x128x128xf32> to vector<128x128xf32>
    %cst_142 = arith.constant dense<0.000000e+00> : vector<1x128xf32>
    %185 = tpu.matmul %182, %184, %cst_142 {dimension_numbers = #tpu.dot_dimension_numbers<[1], [0], [0], [1], [0, 0, 1, 1], [], []>} : vector<1x128xf32>, vector<128x128xf32>, vector<1x128xf32> -> vector<1x128xf32>
    %186 = arith.addf %181, %185 : vector<1x128xf32>
    %187 = vector.extract_strided_slice %160 {offsets = [5, 0], sizes = [1, 128], strides = [1, 1]} : vector<8x128xf32> to vector<1x128xf32>
    %c5_143 = arith.constant 5 : index
    %c0_144 = arith.constant 0 : index
    %c0_145 = arith.constant 0 : index
    %188 = vector.load %arg9[%c5_143, %c0_144, %c0_145] : memref<8x128x128xf32, #tpu.memory_space<vmem>>, vector<1x128x128xf32>
    %189 = vector.shape_cast %188 : vector<1x128x128xf32> to vector<128x128xf32>
    %cst_146 = arith.constant dense<0.000000e+00> : vector<1x128xf32>
    %190 = tpu.matmul %187, %189, %cst_146 {dimension_numbers = #tpu.dot_dimension_numbers<[1], [0], [0], [1], [0, 0, 1, 1], [], []>} : vector<1x128xf32>, vector<128x128xf32>, vector<1x128xf32> -> vector<1x128xf32>
    %191 = arith.addf %186, %190 : vector<1x128xf32>
    %192 = vector.extract_strided_slice %160 {offsets = [6, 0], sizes = [1, 128], strides = [1, 1]} : vector<8x128xf32> to vector<1x128xf32>
    %c6_147 = arith.constant 6 : index
    %c0_148 = arith.constant 0 : index
    %c0_149 = arith.constant 0 : index
    %193 = vector.load %arg9[%c6_147, %c0_148, %c0_149] : memref<8x128x128xf32, #tpu.memory_space<vmem>>, vector<1x128x128xf32>
    %194 = vector.shape_cast %193 : vector<1x128x128xf32> to vector<128x128xf32>
    %cst_150 = arith.constant dense<0.000000e+00> : vector<1x128xf32>
    %195 = tpu.matmul %192, %194, %cst_150 {dimension_numbers = #tpu.dot_dimension_numbers<[1], [0], [0], [1], [0, 0, 1, 1], [], []>} : vector<1x128xf32>, vector<128x128xf32>, vector<1x128xf32> -> vector<1x128xf32>
    %196 = arith.addf %191, %195 : vector<1x128xf32>
    %197 = vector.extract_strided_slice %160 {offsets = [7, 0], sizes = [1, 128], strides = [1, 1]} : vector<8x128xf32> to vector<1x128xf32>
    %c7_151 = arith.constant 7 : index
    %c0_152 = arith.constant 0 : index
    %c0_153 = arith.constant 0 : index
    %198 = vector.load %arg9[%c7_151, %c0_152, %c0_153] : memref<8x128x128xf32, #tpu.memory_space<vmem>>, vector<1x128x128xf32>
    %199 = vector.shape_cast %198 : vector<1x128x128xf32> to vector<128x128xf32>
    %cst_154 = arith.constant dense<0.000000e+00> : vector<1x128xf32>
    %200 = tpu.matmul %197, %199, %cst_154 {dimension_numbers = #tpu.dot_dimension_numbers<[1], [0], [0], [1], [0, 0, 1, 1], [], []>} : vector<1x128xf32>, vector<128x128xf32>, vector<1x128xf32> -> vector<1x128xf32>
    %201 = arith.addf %196, %200 : vector<1x128xf32>
    %c0_155 = arith.constant 0 : index
    %c0_156 = arith.constant 0 : index
    %202 = vector.load %arg10[%c0_155, %c0_156] : memref<1x128xf32, #tpu.memory_space<vmem>>, vector<1x128xf32>
    %203 = arith.addf %201, %202 : vector<1x128xf32>
    %cst_157 = arith.constant 0.000000e+00 : f32
    %204 = vector.broadcast %cst_157 : f32 to vector<1x128xf32>
    %205 = arith.maximumf %203, %204 : vector<1x128xf32>
    %c0_158 = arith.constant 0 : index
    %c0_159 = arith.constant 0 : index
    %206 = vector.load %arg11[%c0_158, %c0_159] : memref<128x10xf32, #tpu.memory_space<vmem>>, vector<128x10xf32>
    %cst_160 = arith.constant dense<0.000000e+00> : vector<1x10xf32>
    %207 = tpu.matmul %205, %206, %cst_160 {dimension_numbers = #tpu.dot_dimension_numbers<[1], [0], [0], [1], [0, 0, 1, 1], [], []>} : vector<1x128xf32>, vector<128x10xf32>, vector<1x10xf32> -> vector<1x10xf32>
    %c0_161 = arith.constant 0 : index
    %c0_162 = arith.constant 0 : index
    %208 = vector.load %arg12[%c0_161, %c0_162] : memref<1x10xf32, #tpu.memory_space<vmem>>, vector<1x10xf32>
    %209 = arith.addf %207, %208 : vector<1x10xf32>
    %c0_163 = arith.constant 0 : index
    %c0_164 = arith.constant 0 : index
    %c0_165 = arith.constant 0 : index
    %210 = vector.load %arg13[%c0_163, %c0_164, %c0_165] : memref<1x1x10xf32, #tpu.memory_space<vmem>>, vector<1x1x10xf32>
    %211 = vector.shape_cast %210 : vector<1x1x10xf32> to vector<1x10xf32>
    %212 = vector.shape_cast %209 : vector<1x10xf32> to vector<1x1x10xf32>
    tpu.vector_store %arg13[%c0_163, %c0_164, %c0_165], %212 {strides = array<i32>} : memref<1x1x10xf32, #tpu.memory_space<vmem>>, vector<1x1x10xf32>,
    return
  }
  func.func @transform_0(%arg0: i32) -> (i32, i32, i32) {
    %c0_i32 = arith.constant 0 : i32
    %c0_i32_0 = arith.constant 0 : i32
    %c0_i32_1 = arith.constant 0 : i32
    return %arg0, %c0_i32, %c0_i32_0 : i32, i32, i32
  }
  func.func @transform_1(%arg0: i32) -> (i32, i32) {
    %c0_i32 = arith.constant 0 : i32
    %c0_i32_0 = arith.constant 0 : i32
    %c0_i32_1 = arith.constant 0 : i32
    return %c0_i32, %c0_i32_0 : i32, i32
  }
  func.func @transform_2(%arg0: i32) -> (i32, i32, i32) {
    %c0_i32 = arith.constant 0 : i32
    %c0_i32_0 = arith.constant 0 : i32
    %c0_i32_1 = arith.constant 0 : i32
    %c0_i32_2 = arith.constant 0 : i32
    return %c0_i32, %c0_i32_0, %c0_i32_1 : i32, i32, i32
  }
  func.func @transform_3(%arg0: i32) -> (i32, i32) {
    %c0_i32 = arith.constant 0 : i32
    %c0_i32_0 = arith.constant 0 : i32
    %c0_i32_1 = arith.constant 0 : i32
    return %c0_i32, %c0_i32_0 : i32, i32
  }
  func.func @transform_4(%arg0: i32) -> (i32, i32, i32) {
    %c0_i32 = arith.constant 0 : i32
    %c0_i32_0 = arith.constant 0 : i32
    %c0_i32_1 = arith.constant 0 : i32
    %c0_i32_2 = arith.constant 0 : i32
    return %c0_i32, %c0_i32_0, %c0_i32_1 : i32, i32, i32
  }
  func.func @transform_5(%arg0: i32) -> (i32, i32) {
    %c0_i32 = arith.constant 0 : i32
    %c0_i32_0 = arith.constant 0 : i32
    %c0_i32_1 = arith.constant 0 : i32
    return %c0_i32, %c0_i32_0 : i32, i32
  }
  func.func @transform_6(%arg0: i32) -> (i32, i32, i32) {
    %c0_i32 = arith.constant 0 : i32
    %c0_i32_0 = arith.constant 0 : i32
    %c0_i32_1 = arith.constant 0 : i32
    %c0_i32_2 = arith.constant 0 : i32
    return %c0_i32, %c0_i32_0, %c0_i32_1 : i32, i32, i32
  }
  func.func @transform_7(%arg0: i32) -> (i32, i32) {
    %c0_i32 = arith.constant 0 : i32
    %c0_i32_0 = arith.constant 0 : i32
    %c0_i32_1 = arith.constant 0 : i32
    return %c0_i32, %c0_i32_0 : i32, i32
  }
  func.func @transform_8(%arg0: i32) -> (i32, i32, i32) {
    %c0_i32 = arith.constant 0 : i32
    %c0_i32_0 = arith.constant 0 : i32
    %c0_i32_1 = arith.constant 0 : i32
    %c0_i32_2 = arith.constant 0 : i32
    return %c0_i32, %c0_i32_0, %c0_i32_1 : i32, i32, i32
  }
  func.func @transform_9(%arg0: i32) -> (i32, i32) {
    %c0_i32 = arith.constant 0 : i32
    %c0_i32_0 = arith.constant 0 : i32
    %c0_i32_1 = arith.constant 0 : i32
    return %c0_i32, %c0_i32_0 : i32, i32
  }
  func.func @transform_10(%arg0: i32) -> (i32, i32) {
    %c0_i32 = arith.constant 0 : i32
    %c0_i32_0 = arith.constant 0 : i32
    %c0_i32_1 = arith.constant 0 : i32
    return %c0_i32, %c0_i32_0 : i32, i32
  }
  func.func @transform_11(%arg0: i32) -> (i32, i32) {
    %c0_i32 = arith.constant 0 : i32
    %c0_i32_0 = arith.constant 0 : i32
    %c0_i32_1 = arith.constant 0 : i32
    return %c0_i32, %c0_i32_0 : i32, i32
  }
  func.func @transform_12(%arg0: i32) -> (i32, i32, i32) {
    %c0_i32 = arith.constant 0 : i32
    %c0_i32_0 = arith.constant 0 : i32
    %c0_i32_1 = arith.constant 0 : i32
    return %arg0, %c0_i32, %c0_i32_0 : i32, i32, i32
  }
}

</mosaic_0001>

<bundles_post_ra>
// kernel: model_forward.1
= control target key start
LH: loop header
LB: loop body
LE: loop exit
PB: predicated region body
PF: predicated region fallthrough
CT: control target
= control target key end

     0   :  { %17 = vsyncpa [#allocation3], 0  ;;  %s7458_s0 = inlined_call_operand.vmem [shape: f32[2,1,128], index: 0, kind: input, shape index: {}]   ;;  %s7459_s1 = inlined_call_operand.hbm [shape: f32[128,1152], index: 1, kind: input, shape index: {}]   ;;  %s7460_s2 = inlined_call_operand.vmem [shape: f32[9,4,1], index: 2, kind: input, shape index: {}]   ;;  %s7461_s3 = inlined_call_operand.vmem [shape: f32[4,1], index: 3, kind: input, shape index: {}]   ;;  %s7462_s4 = inlined_call_operand.vmem [shape: f32[9,8,4], index: 4, kind: input, shape index: {}]   ;;  %s7463_s5 = inlined_call_operand.vmem [shape: f32[8,1], index: 5, kind: input, shape index: {}]   ;;  %s7464_s6 = inlined_call_operand.vmem [shape: f32[9,8,8], index: 6, kind: input, shape index: {}]   ;;  %s7465_s7 = inlined_call_operand.vmem [shape: f32[8,1], index: 7, kind: input, shape index: {}]   ;;  %s7466_s8 = inlined_call_operand.hbm [shape: f32[8,128,128], index: 8, kind: input, shape index: {}]   ;;  %s7467_s9 = inlined_call_operand.vmem [shape: f32[1,128], index: 9, kind: input, shape index: {}]   ;;  %s7468_s10 = inlined_call_operand.vmem [shape: f32[128,10], index: 10, kind: input, shape index: {}]   ;;  %s7469_s11 = inlined_call_operand.vmem [shape: f32[1,10], index: 11, kind: input, shape index: {}]   ;;  %s7470_s12 = inlined_call_operand.hbm [shape: f32[2,1,10], index: 12, kind: output, shape index: {}]  }
   0x1   :  { %18 = vsyncpa [#allocation6], 0 }
   0x2   :  { %19 = vsyncpa [#allocation4], 0 }
   0x3   :  { %21 = vsyncpa [#allocation4 + $0x1], 0  ;;  %s6502_s21 = smov 0   ;;  %s6504_s22 = smov 0  }
   0x4   :  { %s6506_s23 = smov 0   ;;  %s6508_s24 = smov 0  }
   0x5 LB: > { %7534 = sst [smem:[#allocation11_spill]] %s6412_s21  ;;  %s6523_s25 = sadd.s32 4294967295, %s6424_s24   ;;  %s6424_s24 = sphi %s6508_s24, %s7622_s24   ;;  %s6420_s23 = sphi %s6506_s23, %s7627_s23   ;;  %s6416_s22 = sphi %s6504_s22, %s7626_s22   ;;  %s6412_s21 = sphi %s6502_s21, %s7625_s21  }
   0x6   : > { %7535 = sst [smem:[#allocation12_spill]] %s6420_s23  ;;  %s4663_s26 = sadd.s32 4294967294, %s6424_s24  }
   0x7   : > { %7536 = sst [smem:[#allocation13_spill]] %s6424_s24  ;;  %s6527_s27 = sadd.s32 1, %s6424_s24  }
   0x8   : > { %7537 = sst [smem:[#allocation14_spill]] %s6527_s27  ;;  %s291_s28 = sadd.s32 1, %s6420_s23 }
   0x9   : > { %s288_s29 = ssub.s32 %s6424_s24, %s6527_s27  ;;  %p301_p0 = scmp.ne.s32.totalorder %s6420_s23, %s6416_s22 }
   0xa   : > { %p289_p1 = scmp.eq.s32.totalorder %s288_s29, 0  ;;  %p302_p2 = scmp.eq.s32.totalorder %s6523_s25, 1 }
   0xb   : > { %p307_p3 = scmp.ne.s32.totalorder %s6416_s22, %s6412_s21  ;;  %p308_p4 = scmp.eq.s32.totalorder %s4663_s26, 1 }
   0xc   : > { %s6538_s30 = scalar_select %p289_p1, %s6420_s23, %s291_s28  }
   0xd   : > { %p6540_p5 = por %p302_p2, %p301_p0  ;;  %p6544_p6 = por %p308_p4, %p307_p3 }
   0xe   : > { %7538 = sst [smem:[#allocation15_spill]] %s6538_s30  ;;  %p4664_p7 = scmp.ge.s32.totalorder %s6424_s24, 1 }
   0xf   : > { %s7539_s13 = scalar_select %p6540_p5, 1, 0 }
  0x10   : > { %s7540_s14 = scalar_select %p6544_p6, 1, 0 }
  0x11   : > { %p315_p8 = scmp.lt.s32.totalorder %s6424_s24, 3  ;;  %p7474_p9 = scmp.eq.s32.totalorder %s6523_s25, 0 }
  0x12   : > { %7541 = sst [smem:[#allocation16_spill]] %s7540_s14  ;;  %s6426_s16 = smov [#allocation2]  }
  0x13   : > { %p6551_p10 = pnand %p4664_p7, %p315_p8  ;;  %s327_s17 = sshll.u32 %s6426_s16, 4  ;;  %s328_s17 = int_to_ptr.vmem [resolvable:$true] %s327_s17 }
  0x14   : > { %s6427_s19 = smov [#allocation5]   ;;  %s6298_s29 = scalar_lea.hbm %s7459_s1, 18432 }
  0x15   : > { %s7542_s15 = scalar_select %p6551_p10, 1, 0 }
  0x16   : > { %p6238_p11 = pneg %p6551_p10  ;;  %s358_s20 = sshll.u32 %s6427_s19, 4  ;;  %s6563_s20 = int_to_ptr.vmem [resolvable:$true] %s358_s20 }
  0x17   : > { %p6299_p13 = scmp.ne.s32.totalorder %s7459_s1, %s6298_s29  ;;  %p6305_p3 = scmp.lt.u32.totalorder %s6298_s29, %s7459_s1 }
  0x18   : > { %p6559_p12 = pnand %p7474_p9, %p6238_p11 }
  0x1a   : > { %p6300_p0 = pneg %p6559_p12 }
  0x1c   : > { %p6301_p1 = pnand %p6300_p0, %p6299_p13 }
  0x1e   : > { %p6302_p2 = pneg %p6301_p1 }
  0x20   : > { %p6307_p4 = pnand %p6305_p3, %p6302_p2 }
  0x22   : > { %6310 = shalt.err (!%p6307_p4)
}
  0x23   : > { %s6311_s19 = scalar_lea.vmem %s328_s17, 18432  ;;  %p6319_p9 = scmp.lt.s32.totalorder %s328_s17, %s328_s17 }
  0x24   : > { %p6312_p7 = scmp.ne.s32.totalorder %s328_s17, %s6311_s19  ;;  %p6320_p6 = scmp.lt.s32.totalorder %s6311_s19, %s6311_s19 }
  0x26   : > { %p6314_p8 = pnand %p6312_p7, %p6300_p0  ;;  %p6321_p5 = por %p6320_p6, %p6319_p9 }
  0x28   : > { %p6315_p11 = pneg %p6314_p8 }
  0x2a   : > { %p6322_p10 = pnand %p6321_p5, %p6315_p11 }
  0x2c   : > { %6325 = shalt.err (!%p6322_p10)
}
  0x2d   : > { %s6428_s30 = smov 1152   ;;  %s6429_s26 = smov 72  }
  0x2e   : > { %6241 = dma.hbm_to_vmem [thread:$0]  (!%p6559_p12), %s7459_s1, 18432, %s328_s17, [#allocation3], %s6428_s30, %s6428_s30, %s6429_s26  }
  0x2f   : > { %s6326_s16 = scalar_lea.hbm %s7466_s8, 16384 }
  0x30   : > { %p6327_p13 = scmp.ne.s32.totalorder %s7466_s8, %s6326_s16  ;;  %p6333_p9 = scmp.lt.u32.totalorder %s6326_s16, %s7466_s8 }
  0x32   : > { %p6329_p5 = pnand %p6327_p13, %p6300_p0 }
  0x34   : > { %p6330_p6 = pneg %p6329_p5 }
  0x36   : > { %p6335_p10 = pnand %p6333_p9, %p6330_p6 }
  0x38   : > { %6338 = shalt.err (!%p6335_p10)
}
  0x39   : > { %s6339_s17 = scalar_lea.vmem %s6563_s20, 16384  ;;  %p6347_p4 = scmp.lt.s32.totalorder %s6563_s20, %s6563_s20 }
  0x3a   : > { %p6340_p1 = scmp.ne.s32.totalorder %s6563_s20, %s6339_s17  ;;  %p6348_p7 = scmp.lt.s32.totalorder %s6339_s17, %s6339_s17 }
  0x3c   : > { %p6342_p2 = pnand %p6340_p1, %p6300_p0  ;;  %p6349_p8 = por %p6348_p7, %p6347_p4 }
  0x3e   : > { %p6343_p3 = pneg %p6342_p2 }
  0x40   : > { %p6350_p11 = pnand %p6349_p8, %p6343_p3 }
  0x42   : > { %6353 = shalt.err (!%p6350_p11)
}
  0x43   : > { %s6430_s21 = smov 128   ;;  %s6431_s24 = smov 8  }
  0x44   : > { %6244 = dma.hbm_to_vmem [thread:$0]  (!%p6559_p12), %s7466_s8, 16384, %s6563_s20, [#allocation6], %s6430_s21, %s6430_s21, %s6431_s24  }
  0x45   : > { %p7544_p13 = scmp.ne.s32.totalorder %s7542_s15, 0 }
  0x47   : > { %389 = sbr.rel (%p7544_p13) target bundleno = 2150 (0x866), region = 68 }
  0x4e   : > { %p7545_p0 = scmp.eq.s32.totalorder %s6523_s25, 0 }
  0x50   : > { %6399 = dma.done.wait (%p7545_p0), [#allocation3], 18432   ;;  %p7546_p5 = pmov %p7545_p0 }
  0x51   : > { %p7547_p6 = pmov %p7545_p0 }
  0x52   : > { %6401 = vsyncadd (%p7546_p5), [#allocation3], 4294948864 }
  0x53   : > { %6403 = dma.done.wait (%p7547_p6), [#allocation6], 16384   ;;  %p7548_p9 = pmov %p7545_p0 }
  0x54   : > { %v7480_v0 = vmov 0.0   ;;  %v437_v1 = vld [vmem:[#allocation2 + $0x8] sm:$0xff]  ;;  %v446_v2 = vld [vmem:[#allocation2 + $0x50] sm:$0xff]  ;;  %v436_v3 = vld [vmem:[#allocation2] sm:$0xff]  ;;  %p432_p12 = scmp.lt.s32.totalorder %s6523_s25, 1  ;;  %vm6434_vm0 = vmmov 0  }
  0x55   : > { %6405 = vsyncadd (%p7548_p9), [#allocation6], 4294950912  ;;  %644 = vmatprep.mubr.f32.mxu0 %v7480_v0  ;;  %715 = vmatprep.mubr.f32.mxu1 %v7480_v0  ;;  %v6624_v4 = vpack.c.bf16 %v446_v2, %v437_v1  ;;  %v445_v5 = vld [vmem:[#allocation2 + $0x48] sm:$0xff]  ;;  %v455_v6 = vld [vmem:[#allocation2 + $0x98] sm:$0xff]  ;;  %vm941_vm1 = vcmask 1040384   ;;  %vm937_vm2 = vcmask 7168  }
  0x56   : > { %v464_v7 = vld [vmem:[#allocation2 + $0xe0] sm:$0xff]  ;;  %v6626_v8 = vpack.c.bf16 %v445_v5, %v436_v3  ;;  %v454_v10 = vld [vmem:[#allocation2 + $0x90] sm:$0xff]  ;;  %v463_v11 = vld [vmem:[#allocation2 + $0xd8] sm:$0xff]  ;;  %s6696_s15 = scalar_select %p432_p12, %s6523_s25, 1  ;;  %vm2013_vm3 = vcmask 1043456   ;;  %vm2009_vm4 = vcmask 31744  }
  0x57   : > { %v6628_v9 = vpack.c.bf16 %v464_v7, %v455_v6  ;;  %v473_v12 = vld [vmem:[#allocation2 + $0x128] sm:$0xff]  ;;  %5557 = vmatprep.subr.bf16.mxu0 %v6624_v4  ;;  %v482_v13 = vld [vmem:[#allocation2 + $0x170] sm:$0xff]  ;;  %v6632_v14 = vpack.c.bf16 %v463_v11, %v454_v10  ;;  %v472_v16 = vld [vmem:[#allocation2 + $0x120] sm:$0xff]  ;;  %vm3081_vm5 = vcmask 64512   ;;  %s430_s16 = sand.u32 1, %s6416_s22   ;;  %s4740_s21 = sshll.u32 %s6523_s25, 4 }
  0x58   : > { %5559 = vmatpush1.bf16.msra.mxu0 %v6626_v8  ;;  %v6635_v15 = vpack.c.bf16 %v482_v13, %v473_v12  ;;  %v481_v17 = vld [vmem:[#allocation2 + $0x168] sm:$0xff]  ;;  %v491_v18 = vld [vmem:[#allocation2 + $0x1b8] sm:$0xff]  ;;  %v500_v19 = vld [vmem:[#allocation2 + $0x200] sm:$0xff]  ;;  %s434_s26 = scalar_lea.vmem %s7458_s0, %s6696_s15  ;;  %s431_s24 = scalar_lea.vmem [#allocation7], %s430_s16  ;;  %vm4574_vm6 = vcmask 73728  }
  0x59   : > { %5561 = vmatprep.subr.bf16.mxu0 %v6628_v9  ;;  %v439_v20 = vld [vmem:[#allocation2 + $0x18] sm:$0xff]  ;;  %v448_v21 = vld [vmem:[#allocation2 + $0x60] sm:$0xff]  ;;  %v438_v22 = vld [vmem:[#allocation2 + $0x10] sm:$0xff]  ;;  %v6638_v24 = vpack.c.bf16 %v481_v17, %v472_v16  ;;  %v6645_v29 = vpack.c.bf16 %v500_v19, %v491_v18  ;;  %s4589_s14 = sshll.u32 %s431_s24, 4  ;;  %s7416_s18 = scalar_lea.hbm %s7470_s12, %s4740_s21  ;;  %s7418_s14 = int_to_ptr.vmem [resolvable:$true] %s4589_s14 }
  0x5a   : > { %v447_v23 = vld [vmem:[#allocation2 + $0x58] sm:$0xff]  ;;  %v490_v25 = vld [vmem:[#allocation2 + $0x1b0] sm:$0xff]  ;;  %v6640_v27 = vpack.c.bf16 %v448_v21, %v439_v20  ;;  %v509_v30 = vld [vmem:[#allocation2 + $0x248] sm:$0xff]  ;;  %s4577_s20 = scalar_lea.sflag [#allocation4], %s430_s16  ;;  %p7617_p1 = scmp.ne.s32.totalorder %s7539_s13, 0 }
  0x5b   : > { %v499_v26 = vld [vmem:[#allocation2 + $0x1f8] sm:$0xff]  ;;  %v6642_v28 = vpack.c.bf16 %v447_v23, %v438_v22  ;;  %v457_v31 = vld [vmem:[#allocation2 + $0xa8] sm:$0xff]  ;;  %v466_v32 = vld [vmem:[#allocation2 + $0xf0] sm:$0xff]  ;;  %s6436_s25 = smov [#allocation7]  }
  0x5c   : > { %5563 = vmatpush1.bf16.msra.mxu0 %v6632_v14  ;;  %v518_v33 = vld [vmem:[#allocation2 + $0x290] sm:$0xff]  ;;  %5589 = vmatprep.subr.bf16.mxu1 %v6640_v27  ;;  %v6648_v34 = vpack.c.bf16 %v466_v32, %v457_v31  ;;  %v456_v35 = vld [vmem:[#allocation2 + $0xa0] sm:$0xff]  ;;  %v465_v36 = vld [vmem:[#allocation2 + $0xe8] sm:$0xff]  ;;  %v6654_v38 = vpack.c.bf16 %v499_v26, %v490_v25  ;;  %s6358_s23 = sshll.u32 %s6436_s25, 4  ;;  %s6359_s23 = int_to_ptr.vmem [resolvable:$false] %s6358_s23 }
  0x5d   : > { %5565 = vmatprep.subr.bf16.mxu0 %v6635_v15  ;;  %5591 = vmatpush1.bf16.msra.mxu1 %v6642_v28  ;;  %v6651_v37 = vpack.c.bf16 %v465_v36, %v456_v35  ;;  %v475_v39 = vld [vmem:[#allocation2 + $0x138] sm:$0xff]  ;;  %v484_v40 = vld [vmem:[#allocation2 + $0x180] sm:$0xff]  ;;  %v474_v41 = vld [vmem:[#allocation2 + $0x130] sm:$0xff]  ;;  %v6658_v42 = vpack.c.bf16 %v518_v33, %v509_v30  ;;  %s6360_s27 = scalar_lea.vmem %s6359_s23, 32  ;;  %p6361_p4 = scmp.lt.s32.totalorder %s7418_s14, %s6359_s23 }
  0x5e   : > { %5593 = vmatprep.subr.bf16.mxu1 %v6648_v34  ;;  %v508_v43 = vld [vmem:[#allocation2 + $0x240] sm:$0xff]  ;;  %v517_v44 = vld [vmem:[#allocation2 + $0x288] sm:$0xff]  ;;  %v6660_v45 = vpack.c.bf16 %v484_v40, %v475_v39  ;;  %v483_v46 = vld [vmem:[#allocation2 + $0x178] sm:$0xff] }
  0x5f   : > { %v527_v47 = vld [vmem:[#allocation2 + $0x2d8] sm:$0xff]  ;;  %v536_v48 = vld [vmem:[#allocation2 + $0x320] sm:$0xff]  ;;  %v493_v49 = vld [vmem:[#allocation2 + $0x1c8] sm:$0xff]  ;;  %v6663_v50 = vpack.c.bf16 %v483_v46, %v474_v41  ;;  %v6666_v52 = vpack.c.bf16 %v517_v44, %v508_v43 }
  0x60   : > { %5567 = vmatpush1.bf16.msra.mxu0 %v6638_v24  ;;  %v502_v51 = vld [vmem:[#allocation2 + $0x210] sm:$0xff]  ;;  %v492_v54 = vld [vmem:[#allocation2 + $0x1c0] sm:$0xff]  ;;  %v501_v55 = vld [vmem:[#allocation2 + $0x208] sm:$0xff]  ;;  %v6672_v56 = vpack.c.bf16 %v536_v48, %v527_v47 }
  0x61   : > { %5569 = vmatprep.subr.bf16.mxu0 %v6645_v29  ;;  %5595 = vmatpush1.bf16.msra.mxu1 %v6651_v37  ;;  %7549 = vst [vmem:[#allocation17_spill] sm:$0xff] %v6663_v50  ;;  %v6669_v53 = vpack.c.bf16 %v502_v51, %v493_v49  ;;  %v526_v57 = vld [vmem:[#allocation2 + $0x2d0] sm:$0xff]  ;;  %v535_v58 = vld [vmem:[#allocation2 + $0x318] sm:$0xff]  ;;  %v545_v60 = vld [vmem:[#allocation2 + $0x368] sm:$0xff]  ;;  %v6675_v63 = vpack.c.bf16 %v501_v55, %v492_v54 }
  0x62   : > { %5597 = vmatprep.subr.bf16.mxu1 %v6660_v45  ;;  %v511_v59 = vld [vmem:[#allocation2 + $0x258] sm:$0xff]  ;;  %v554_v61 = vld [vmem:[#allocation2 + $0x3b0] sm:$0xff]  ;;  %v520_v62 = vld [vmem:[#allocation2 + $0x2a0] sm:$0xff]  ;;  %v6678_v1 = vpack.c.bf16 %v535_v58, %v526_v57 }
  0x63   : > { %7550 = vst [vmem:[#allocation18_spill] sm:$0xff] %v6669_v53  ;;  %7551 = vst [vmem:[#allocation19_spill] sm:$0xff] %v6675_v63  ;;  %v544_v2 = vld [vmem:[#allocation2 + $0x360] sm:$0xff]  ;;  %v6682_v3 = vpack.c.bf16 %v520_v62, %v511_v59  ;;  %v510_v5 = vld [vmem:[#allocation2 + $0x250] sm:$0xff]  ;;  %v6685_v7 = vpack.c.bf16 %v554_v61, %v545_v60 }
  0x64   : > { %5571 = vmatpush1.bf16.msra.mxu0 %v6654_v38  ;;  %v519_v6 = vld [vmem:[#allocation2 + $0x298] sm:$0xff]  ;;  %v553_v10 = vld [vmem:[#allocation2 + $0x3a8] sm:$0xff]  ;;  %v538_v12 = vld [vmem:[#allocation2 + $0x330] sm:$0xff] }
  0x65   : > { %5573 = vmatprep.subr.bf16.mxu0 %v6658_v42  ;;  %5599 = vmatpush1.bf16.msra.mxu1 %v6663_v50  ;;  %7552 = vst [vmem:[#allocation20_spill] sm:$0xff] %v6682_v3  ;;  %v529_v11 = vld [vmem:[#allocation2 + $0x2e8] sm:$0xff]  ;;  %v563_v13 = vld [vmem:[#allocation2 + $0x3f8] sm:$0xff]  ;;  %v572_v16 = vld [vmem:[#allocation2 + $0x440] sm:$0xff]  ;;  %v6688_v17 = vpack.c.bf16 %v519_v6, %v510_v5  ;;  %v6691_v18 = vpack.c.bf16 %v553_v10, %v544_v2 }
  0x66   : > { %5601 = vmatprep.subr.bf16.mxu1 %v6669_v53  ;;  %v562_v19 = vld [vmem:[#allocation2 + $0x3f0] sm:$0xff]  ;;  %v6699_v20 = vpack.c.bf16 %v538_v12, %v529_v11  ;;  %v528_v21 = vld [vmem:[#allocation2 + $0x2e0] sm:$0xff]  ;;  %v537_v22 = vld [vmem:[#allocation2 + $0x328] sm:$0xff]  ;;  %v6702_v23 = vpack.c.bf16 %v572_v16, %v563_v13 }
  0x67   : > { %7553 = vst [vmem:[#allocation21_spill] sm:$0xff] %v6688_v17  ;;  %v571_v25 = vld [vmem:[#allocation2 + $0x438] sm:$0xff]  ;;  %v556_v30 = vld [vmem:[#allocation2 + $0x3c0] sm:$0xff]  ;;  %v441_v31 = vld [vmem:[#allocation2 + $0x28] sm:$0xff]  ;;  %v6705_v33 = vpack.c.bf16 %v537_v22, %v528_v21 }
  0x68   : > { %5575 = vmatpush1.bf16.msra.mxu0 %v6666_v52  ;;  %7554 = vst [vmem:[#allocation22_spill] sm:$0xff] %v6699_v20  ;;  %7555 = vst [vmem:[#allocation23_spill] sm:$0xff] %v6702_v23  ;;  %v547_v26 = vld [vmem:[#allocation2 + $0x378] sm:$0xff]  ;;  %v450_v32 = vld [vmem:[#allocation2 + $0x70] sm:$0xff]  ;;  %v6708_v35 = vpack.c.bf16 %v571_v25, %v562_v19 }
  0x69   : > { %5577 = vmatprep.subr.bf16.mxu0 %v6672_v56  ;;  %5603 = vmatpush1.bf16.msra.mxu1 %v6675_v63  ;;  %7556 = vst [vmem:[#allocation24_spill] sm:$0xff] %v6705_v33  ;;  %v440_v36 = vld [vmem:[#allocation2 + $0x20] sm:$0xff]  ;;  %v6715_v39 = vpack.c.bf16 %v556_v30, %v547_v26  ;;  %v546_v40 = vld [vmem:[#allocation2 + $0x370] sm:$0xff]  ;;  %v555_v41 = vld [vmem:[#allocation2 + $0x3b8] sm:$0xff]  ;;  %v6718_v43 = vpack.c.bf16 %v450_v32, %v441_v31 }
  0x6a   : > { %5605 = vmatprep.subr.bf16.mxu1 %v6682_v3  ;;  %7557 = vst [vmem:[#allocation25_spill] sm:$0xff] %v6708_v35  ;;  %v449_v44 = vld [vmem:[#allocation2 + $0x68] sm:$0xff]  ;;  %v574_v47 = vld [vmem:[#allocation2 + $0x450] sm:$0xff]  ;;  %v459_v48 = vld [vmem:[#allocation2 + $0xb8] sm:$0xff]  ;;  %v6723_v54 = vpack.c.bf16 %v555_v41, %v546_v40 }
  0x6b   : > { %7558 = vst [vmem:[#allocation26_spill] sm:$0xff] %v6715_v39  ;;  %7559 = vst [vmem:[#allocation27_spill] sm:$0xff] %v6718_v43  ;;  %v565_v46 = vld [vmem:[#allocation2 + $0x408] sm:$0xff]  ;;  %v468_v49 = vld [vmem:[#allocation2 + $0x100] sm:$0xff]  ;;  %v6726_v55 = vpack.c.bf16 %v449_v44, %v440_v36 }
  0x6c   : > { %5579 = vmatpush1.bf16.msra.mxu0 %v6678_v1  ;;  %v6720_v51 = vld [vmem:[%s434_s26] sm:$0x1]  ;;  %7560 = vst [vmem:[#allocation28_spill] sm:$0xff] %v6723_v54  ;;  %v458_v57 = vld [vmem:[#allocation2 + $0xb0] sm:$0xff]  ;;  %v6729_v58 = vpack.c.bf16 %v574_v47, %v565_v46  ;;  %v573_v60 = vld [vmem:[#allocation2 + $0x448] sm:$0xff]  ;;  %v6732_v61 = vpack.c.bf16 %v468_v49, %v459_v48  ;;  %s6354_s26 = scalar_lea.vmem %s7418_s14, 16 }
  0x6d   : > { %5581 = vmatprep.subr.bf16.mxu0 %v6685_v7  ;;  %5607 = vmatpush1.bf16.msra.mxu1 %v6688_v17  ;;  %v564_v59 = vld [vmem:[#allocation2 + $0x400] sm:$0xff]  ;;  %v467_v62 = vld [vmem:[#allocation2 + $0xf8] sm:$0xff]  ;;  %v477_v6 = vld [vmem:[#allocation2 + $0x148] sm:$0xff]  ;;  %p6355_p10 = scmp.ne.s32.totalorder %s7418_s14, %s6354_s26  ;;  %p6362_p7 = scmp.lt.s32.totalorder %s6360_s27, %s6354_s26 }
  0x6e   : > { %5609 = vmatprep.subr.bf16.mxu1 %v6699_v20  ;;  %7561 = vst [vmem:[#allocation29_spill] sm:$0xff] %v6729_v58  ;;  %v443_v2 = vld [vmem:[#allocation2 + $0x38] sm:$0xff]  ;;  %v452_v5 = vld [vmem:[#allocation2 + $0x80] sm:$0xff]  ;;  %v486_v10 = vld [vmem:[#allocation2 + $0x190] sm:$0xff]  ;;  %v6736_v11 = vpack.c.bf16 %v573_v60, %v564_v59  ;;  %v6739_v12 = vpack.c.bf16 %v467_v62, %v458_v57 }
  0x6f   : > { %v476_v13 = vld [vmem:[#allocation2 + $0x140] sm:$0xff]  ;;  %v6742_v16 = vpack.c.bf16 %v452_v5, %v443_v2  ;;  %v442_v19 = vld [vmem:[#allocation2 + $0x30] sm:$0xff]  ;;  %v451_v21 = vld [vmem:[#allocation2 + $0x78] sm:$0xff]  ;;  %v6745_v22 = vpack.c.bf16 %v486_v10, %v477_v6  ;;  %p6356_p2 = pnand %p6355_p10, %p7617_p1  ;;  %p6363_p8 = por %p6362_p7, %p6361_p4 }
  0x70   : > { %5583 = vmatpush1.bf16.msra.mxu0 %v6691_v18  ;;  %7562 = vst [vmem:[#allocation30_spill] sm:$0xff] %v6736_v11  ;;  %v485_v25 = vld [vmem:[#allocation2 + $0x188] sm:$0xff]  ;;  %v470_v30 = vld [vmem:[#allocation2 + $0x110] sm:$0xff]  ;;  %v495_v31 = vld [vmem:[#allocation2 + $0x1d8] sm:$0xff]  ;;  %v6749_v36 = vpack.c.bf16 %v451_v21, %v442_v19 }
  0x71   : > { %5585 = vmatprep.subr.bf16.mxu0 %v6702_v23  ;;  %5611 = vmatpush1.bf16.msra.mxu1 %v6705_v33  ;;  %7563 = vst [vmem:[#allocation31_spill] sm:$0xff] %v6742_v16  ;;  %v461_v26 = vld [vmem:[#allocation2 + $0xc8] sm:$0xff]  ;;  %v504_v32 = vld [vmem:[#allocation2 + $0x220] sm:$0xff]  ;;  %v6752_v40 = vpack.c.bf16 %v485_v25, %v476_v13  ;;  %v494_v41 = vld [vmem:[#allocation2 + $0x1d0] sm:$0xff]  ;;  %p6357_p3 = pneg %p6356_p2 }
  0x72   : > { %5613 = vmatprep.subr.bf16.mxu1 %v6715_v39  ;;  %v6755_v44 = vpack.c.bf16 %v470_v30, %v461_v26  ;;  %v460_v46 = vld [vmem:[#allocation2 + $0xc0] sm:$0xff]  ;;  %v469_v47 = vld [vmem:[#allocation2 + $0x108] sm:$0xff]  ;;  %v6758_v48 = vpack.c.bf16 %v504_v32, %v495_v31  ;;  %v503_v49 = vld [vmem:[#allocation2 + $0x218] sm:$0xff] }
  0x73   : > { %7564 = vst [vmem:[#allocation32_spill] sm:$0xff] %v6752_v40  ;;  %v479_v57 = vld [vmem:[#allocation2 + $0x158] sm:$0xff]  ;;  %v488_v59 = vld [vmem:[#allocation2 + $0x1a0] sm:$0xff]  ;;  %v513_v60 = vld [vmem:[#allocation2 + $0x268] sm:$0xff]  ;;  %v6762_v2 = vpack.c.bf16 %v469_v47, %v460_v46  ;;  %v6766_v5 = vpack.c.bf16 %v503_v49, %v494_v41  ;;  %p6364_p11 = pnand %p6363_p8, %p6357_p3 }
  0x74   : > { %5587 = vmatpush1.bf16.msra.mxu0 %v6708_v35  ;;  %7565 = vst [vmem:[#allocation33_spill] sm:$0xff] %v6758_v48  ;;  %v522_v62 = vld [vmem:[#allocation2 + $0x2b0] sm:$0xff]  ;;  %v512_v6 = vld [vmem:[#allocation2 + $0x260] sm:$0xff]  ;;  %v6769_v10 = vpack.c.bf16 %v488_v59, %v479_v57  ;;  %v487_v19 = vld [vmem:[#allocation2 + $0x198] sm:$0xff] }
  0x75   : > { %5621 = vmatprep.subr.bf16.mxu0 %v6718_v43  ;;  %5615 = vmatpush1.bf16.msra.mxu1 %v6723_v54  ;;  %7566 = vst [vmem:[#allocation34_spill] sm:$0xff] %v6766_v5  ;;  %v478_v13 = vld [vmem:[#allocation2 + $0x150] sm:$0xff]  ;;  %v6772_v21 = vpack.c.bf16 %v522_v62, %v513_v60  ;;  %v521_v25 = vld [vmem:[#allocation2 + $0x2a8] sm:$0xff]  ;;  %v531_v31 = vld [vmem:[#allocation2 + $0x2f8] sm:$0xff] }
  0x76   : > { %5617 = vmatprep.subr.bf16.mxu1 %v6729_v58  ;;  %v497_v26 = vld [vmem:[#allocation2 + $0x1e8] sm:$0xff]  ;;  %v506_v30 = vld [vmem:[#allocation2 + $0x230] sm:$0xff]  ;;  %v540_v32 = vld [vmem:[#allocation2 + $0x340] sm:$0xff]  ;;  %v6775_v41 = vpack.c.bf16 %v487_v19, %v478_v13  ;;  %v6778_v46 = vpack.c.bf16 %v521_v25, %v512_v6 }
  0x77   : > { %645 = vmatmul.mubr.f32.vlgmr.msra.gmra.mrb[0].mxu0 %v6720_v51  ;;  %7567 = vst [vmem:[#allocation35_spill] sm:$0xff] %v6772_v21  ;;  %v530_v47 = vld [vmem:[#allocation2 + $0x2f0] sm:$0xff]  ;;  %v6781_v49 = vpack.c.bf16 %v506_v30, %v497_v26  ;;  %v496_v57 = vld [vmem:[#allocation2 + $0x1e0] sm:$0xff]  ;;  %v505_v59 = vld [vmem:[#allocation2 + $0x228] sm:$0xff]  ;;  %v6784_v60 = vpack.c.bf16 %v540_v32, %v531_v31 }
  0x78   : > { %5623 = vmatpush1.bf16.msra.mxu0 %v6726_v55  ;;  %786 = vmatprep.mubr.f32.mxu0 %v7480_v0  ;;  %7568 = vst [vmem:[#allocation36_spill] sm:$0xff] %v6775_v41  ;;  %7569 = vst [vmem:[#allocation37_spill] sm:$0xff] %v6778_v46  ;;  %v539_v62 = vld [vmem:[#allocation2 + $0x338] sm:$0xff]  ;;  %v549_v13 = vld [vmem:[#allocation2 + $0x388] sm:$0xff]  ;;  %v6787_v6 = vpack.c.bf16 %v505_v59, %v496_v57 }
  0x79   : > { %5625 = vmatprep.subr.bf16.mxu0 %v6732_v61  ;;  %5619 = vmatpush1.bf16.msra.mxu1 %v6736_v11  ;;  %7570 = vst [vmem:[#allocation38_spill] sm:$0xff] %v6781_v49  ;;  %7571 = vst [vmem:[#allocation39_spill] sm:$0xff] %v6784_v60  ;;  %v558_v19 = vld [vmem:[#allocation2 + $0x3d0] sm:$0xff]  ;;  %v6790_v25 = vpack.c.bf16 %v539_v62, %v530_v47  ;;  %v548_v26 = vld [vmem:[#allocation2 + $0x380] sm:$0xff] }
  0x7a   : > { %5653 = vmatprep.subr.bf16.mxu1 %v6742_v16  ;;  %7572 = vst [vmem:[#allocation40_spill] sm:$0xff] %v6787_v6  ;;  %v514_v31 = vld [vmem:[#allocation2 + $0x270] sm:$0xff]  ;;  %v523_v32 = vld [vmem:[#allocation2 + $0x2b8] sm:$0xff]  ;;  %v576_v59 = vld [vmem:[#allocation2 + $0x460] sm:$0xff] }
  0x7b   : > { %v567_v57 = vld [vmem:[#allocation2 + $0x418] sm:$0xff]  ;;  %v6799_v47 = vpack.c.bf16 %v523_v32, %v514_v31 }
  0x7c   : > { %5627 = vmatpush1.bf16.msra.mxu0 %v6739_v12  ;;  %716 = vmatmul.mubr.f32.vlgmr.msra.gmra.mrb[0].mxu1 %v6720_v51  ;;  %v559_v32 = vld [vmem:[#allocation2 + $0x3d8] sm:$0xff] }
  0x7d   : > { %5629 = vmatprep.subr.bf16.mxu0 %v6745_v22  ;;  %5655 = vmatpush1.bf16.msra.mxu1 %v6749_v36 }
  0x7e   : > { %857 = vmatprep.mubr.f32.mxu1 %v7480_v0  ;;  %5657 = vmatprep.subr.bf16.mxu1 %v6755_v44  ;;  %v515_v0 = vld [vmem:[#allocation2 + $0x278] sm:$0xff] }
  0x80   : > { %5631 = vmatpush1.bf16.msra.mxu0 %v6752_v40  ;;  %v533_v40 = vld [vmem:[#allocation2 + $0x308] sm:$0xff] }
  0x81   : > { %5633 = vmatprep.subr.bf16.mxu0 %v6758_v48  ;;  %5659 = vmatpush1.bf16.msra.mxu1 %v6762_v2  ;;  %v524_v48 = vld [vmem:[#allocation2 + $0x2c0] sm:$0xff] }
  0x82   : > { %5661 = vmatprep.subr.bf16.mxu1 %v6769_v10  ;;  %v6793_v30 = vpack.c.bf16 %v524_v48, %v515_v0  ;;  %v566_v0 = vld [vmem:[#allocation2 + $0x410] sm:$0xff] }
  0x84   : > { %5635 = vmatpush1.bf16.msra.mxu0 %v6766_v5  ;;  %v557_v5 = vld [vmem:[#allocation2 + $0x3c8] sm:$0xff] }
  0x85   : > { %5637 = vmatprep.subr.bf16.mxu0 %v6772_v21  ;;  %5663 = vmatpush1.bf16.msra.mxu1 %v6775_v41  ;;  %v6796_v21 = vpack.c.bf16 %v558_v19, %v549_v13  ;;  %v542_v41 = vld [vmem:[#allocation2 + $0x350] sm:$0xff]  ;;  %v6802_v62 = vpack.c.bf16 %v557_v5, %v548_v26  ;;  %v532_v13 = vld [vmem:[#allocation2 + $0x300] sm:$0xff]  ;;  %v541_v19 = vld [vmem:[#allocation2 + $0x348] sm:$0xff] }
  0x86   : > { %5665 = vmatprep.subr.bf16.mxu1 %v6781_v49  ;;  %v6805_v48 = vpack.c.bf16 %v542_v41, %v533_v40  ;;  %v551_v49 = vld [vmem:[#allocation2 + $0x398] sm:$0xff]  ;;  %v6811_v31 = vpack.c.bf16 %v541_v19, %v532_v13  ;;  %v444_v26 = vld [vmem:[#allocation2 + $0x40] sm:$0xff]  ;;  %v550_v41 = vld [vmem:[#allocation2 + $0x390] sm:$0xff]  ;;  %v7516_v19 = vmov 0.0|0.0  }
  0x87   : > { %7573 = vst [vmem:[#allocation41_spill] sm:$0xff] %v6796_v21  ;;  %7574 = vst [vmem:[#allocation42_spill] sm:$0xff] %v6802_v62  ;;  %v6821_v13 = vpack.c.bf16 %v559_v32, %v550_v41  ;;  %v489_v32 = vld [vmem:[#allocation2 + $0x1a8] sm:$0xff] }
  0x88   : > { %5639 = vmatpush1.bf16.msra.mxu0 %v6778_v46  ;;  %v575_v46 = vld [vmem:[#allocation2 + $0x458] sm:$0xff] }
  0x89   : > { %5641 = vmatprep.subr.bf16.mxu0 %v6784_v60  ;;  %5667 = vmatpush1.bf16.msra.mxu1 %v6787_v6  ;;  %v6808_v60 = vpack.c.bf16 %v576_v59, %v567_v57  ;;  %v560_v6 = vld [vmem:[#allocation2 + $0x3e0] sm:$0xff]  ;;  %v6814_v5 = vpack.c.bf16 %v575_v46, %v566_v0  ;;  %v453_v57 = vld [vmem:[#allocation2 + $0x88] sm:$0xff] }
  0x8a   : > { %5669 = vmatprep.subr.bf16.mxu1 %v6793_v30  ;;  %v6817_v40 = vpack.c.bf16 %v560_v6, %v551_v49  ;;  %v569_v59 = vld [vmem:[#allocation2 + $0x428] sm:$0xff]  ;;  %v6824_v46 = vpack.c.bf16 %v453_v57, %v444_v26  ;;  %v568_v49 = vld [vmem:[#allocation2 + $0x420] sm:$0xff]  ;;  %v7579_v57 = vmov 0.0  }
  0x8b   : > { %7575 = vst [vmem:[#allocation43_spill] sm:$0xff] %v6808_v60  ;;  %v577_v6 = vld [vmem:[#allocation2 + $0x468] sm:$0xff] }
  0x8c   : > { %5643 = vmatpush1.bf16.msra.mxu0 %v6790_v25  ;;  %7576 = vst [vmem:[#allocation44_spill] sm:$0xff] %v6824_v46  ;;  %v6832_v41 = vpack.c.bf16 %v577_v6, %v568_v49  ;;  %v516_v6 = vld [vmem:[#allocation2 + $0x280] sm:$0xff] }
  0x8d   : > { %5645 = vmatprep.subr.bf16.mxu0 %v6796_v21  ;;  %5671 = vmatpush1.bf16.msra.mxu1 %v6799_v47  ;;  %v578_v21 = vld [vmem:[#allocation2 + $0x470] sm:$0xff] }
  0x8e   : > { %5673 = vmatprep.subr.bf16.mxu1 %v6805_v48  ;;  %v6827_v0 = vpack.c.bf16 %v578_v21, %v569_v59  ;;  %7577 = vst [vmem:[#allocation45_spill] sm:$0xff] %v6832_v41  ;;  %v480_v21 = vld [vmem:[#allocation2 + $0x160] sm:$0xff] }
  0x8f   : > { %v6843_v59 = vpack.c.bf16 %v489_v32, %v480_v21  ;;  %v525_v21 = vld [vmem:[#allocation2 + $0x2c8] sm:$0xff] }
  0x90   : > { %5647 = vmatpush1.bf16.msra.mxu0 %v6802_v62  ;;  %v471_v62 = vld [vmem:[#allocation2 + $0x118] sm:$0xff]  ;;  %v6855_v32 = vpack.c.bf16 %v525_v21, %v516_v6  ;;  %v570_v6 = vld [vmem:[#allocation2 + $0x430] sm:$0xff] }
  0x91   : > { %5649 = vmatprep.subr.bf16.mxu0 %v6808_v60  ;;  %5675 = vmatpush1.bf16.msra.mxu1 %v6811_v31  ;;  %v462_v60 = vld [vmem:[#allocation2 + $0xd0] sm:$0xff]  ;;  %7580 = vst [vmem:[#allocation47_spill] sm:$0xff] %v6843_v59  ;;  %v579_v21 = vld [vmem:[#allocation2 + $0x478] sm:$0xff] }
  0x92   : > { %5677 = vmatprep.subr.bf16.mxu1 %v6817_v40  ;;  %v6835_v26 = vpack.c.bf16 %v471_v62, %v462_v60  ;;  %v498_v60 = vld [vmem:[#allocation2 + $0x1f0] sm:$0xff]  ;;  %v507_v62 = vld [vmem:[#allocation2 + $0x238] sm:$0xff] }
  0x93   : > { %v6851_v49 = vpack.c.bf16 %v507_v62, %v498_v60  ;;  %v552_v60 = vld [vmem:[#allocation2 + $0x3a0] sm:$0xff]  ;;  %v561_v62 = vld [vmem:[#allocation2 + $0x3e8] sm:$0xff] }
  0x94   : > { %5651 = vmatpush1.bf16.msra.mxu0 %v6814_v5  ;;  %7578 = vst [vmem:[#allocation46_spill] sm:$0xff] %v6835_v26 }
  0x95   : > { %5684 = vmatprep.subr.bf16.mxu0 %v7516_v19  ;;  %5679 = vmatpush1.bf16.msra.mxu1 %v6821_v13  ;;  %7581 = vst [vmem:[#allocation48_spill] sm:$0xff] %v6851_v49 }
  0x96   : > { %5681 = vmatprep.subr.bf16.mxu1 %v6827_v0 }
  0x97   : > { %787 = vmatmul.mubr.f32.vlgmr.msra.gmra.mrb[2].mxu0 %v6720_v51 }
  0x98   : > { %5686 = vmatpush3.bf16.msra.mxu0 %v6824_v46  ;;  %5033 = vmatprep.mubr.msk.f32.mxu0 %vm6434_vm0, %v7579_v57  ;;  %v543_v46 = vld [vmem:[#allocation2 + $0x358] sm:$0xff] }
  0x99   : > { %5687 = vmatprep.subr.bf16.mxu0 %v7516_v19  ;;  %5683 = vmatpush1.bf16.msra.mxu1 %v6832_v41 }
  0x9a   : > { %5051 = vmatprep.subr.mxu1 %v7579_v57 }
  0x9c   : > { %5689 = vmatpush3.bf16.msra.mxu0 %v6835_v26  ;;  %858 = vmatmul.mubr.f32.vlgmr.msra.gmra.mrb[2].mxu1 %v6720_v51  ;;  %v534_v26 = vld [vmem:[#allocation2 + $0x310] sm:$0xff] }
  0x9d   : > { %5690 = vmatprep.subr.bf16.mxu0 %v7516_v19  ;;  %5053 = vmatprep.mubr.msk.f32.mxu1 %vm6434_vm0, %v7579_v57  ;;  %v6859_v41 = vpack.c.bf16 %v543_v46, %v534_v26  ;;  %v1644_v46 = vld [vmem:[%s7461_s3] sm:$0xf]  ;;  %v6435_v26 = vmov 0  }
  0x9e   : > { %6296 = vset.pattern.permute.xlu0 %v6435_v26  ;;  %6297 = vset.pattern.permute.xlu1 %v6435_v26  ;;  %v4679_v26 = vld [vmem:[%s7460_s2 + $0xc] sm:$0xf] }
  0x9f   : > { %1647 = vperm.xlu0 %6296, %v1644_v46  }
  0xa0   : > { %5692 = vmatpush3.bf16.msra.mxu0 %v6843_v59  ;;  %v6863_v59 = vpack.c.bf16 %v561_v62, %v552_v60  ;;  %v2716_v60 = vld [vmem:[%s7463_s5] sm:$0xff] }
  0xa1   : > { %5693 = vmatprep.subr.bf16.mxu0 %v7516_v19 }
  0xa2   : > { %7582 = vst [vmem:[#allocation49_spill] sm:$0xff] %v6863_v59 }
  0xa3   : > { %2719 = vperm.xlu0 %6296, %v2716_v60  }
  0xa4   : > { %5695 = vmatpush3.bf16.msra.mxu0 %v6851_v49  ;;  %v6867_v49 = vpack.c.bf16 %v579_v21, %v570_v6  ;;  %v934_v21 = vld [vmem:[%s7460_s2] sm:$0xf] }
  0xa5   : > { %5696 = vmatprep.subr.bf16.mxu0 %v7516_v19 }
  0xa8   : > { %5698 = vmatpush3.bf16.msra.mxu0 %v6855_v32 }
  0xa9   : > { %5699 = vmatprep.subr.bf16.mxu0 %v7516_v19 }
  0xac   : > { %5701 = vmatpush3.bf16.msra.mxu0 %v6859_v41 }
  0xad   : > { %5702 = vmatprep.subr.bf16.mxu0 %v7516_v19 }
  0xb0   : > { %5704 = vmatpush3.bf16.msra.mxu0 %v6863_v59 }
  0xb1   : > { %5705 = vmatprep.subr.bf16.mxu0 %v7516_v19 }
  0xb4   : > { %5707 = vmatpush3.bf16.msra.mxu0 %v6867_v49 }
  0xb5   : > { %5036 = vmatprep.subr.mxu0 %v7579_v57 }
  0xb7   : > { %5034 = vmatmul.mubr.f32.vlgmr.msra.gmra.mrb[4].mxu0 %v6720_v51  ;;  %v4671_v51 = vld [vmem:[%s7460_s2 + $0x4] sm:$0xf] }
  0xb8   : > { %5038 = vmatprep.mubr.msk.f32.mxu0 %vm6434_vm0, %v7579_v57 }
 0x14a   : > { %v646_v62 = vpop.f32.mrb[0].mxu0 }
 0x14b   : > { %v648_v6 = vpop.f32.mrb[1].mxu0 }
 0x14c   : > { %5037 = vmatpush3.msk.msra.mxu0 %vm941_vm1, %v648_v6 }
 0x14d   : > { %5041 = vmatprep.subr.mxu0 %v7579_v57  ;;  %5039 = vmatmul.mubr.msk.f32.vlgmr.msra.gmra.mrb[6].mxu0 %vm937_vm2, %v4671_v51  ;;  %v4682_v51 = vld [vmem:[%s7460_s2 + $0x10] sm:$0xf] }
 0x14e   : > { %5042 = vmatpush3.msk.msra.mxu0 %vm941_vm1, %v646_v62  ;;  %5043 = vmatprep.mubr.msk.f32.mxu0 %vm6434_vm0, %v7579_v57  ;;  %v4676_v62 = vld [vmem:[%s7460_s2 + $0x8] sm:$0xf] }
 0x14f   : > { %5046 = vmatprep.subr.mxu0 %v7579_v57  ;;  %v717_v46 = vpop.f32.mrb[0].mxu1 }
 0x150   : > { %v719_v60 = vpop.f32.mrb[1].mxu1 }
 0x151   : > { %5044 = vmatmul.mubr.msk.f32.vlgmr.msra.gmra.mrb[8].mxu0 %vm937_vm2, %v934_v21  ;;  %5052 = vmatpush3.msk.msra.mxu1 %vm941_vm1, %v719_v60  ;;  %v4688_v60 = vld [vmem:[%s7460_s2 + $0x18] sm:$0xf] }
 0x152   : > { %5047 = vmatpush3.msk.msra.mxu0 %vm941_vm1, %v717_v46  ;;  %5048 = vmatprep.mubr.msk.f32.mxu0 %vm6434_vm0, %v7579_v57  ;;  %v4685_v46 = vld [vmem:[%s7460_s2 + $0x14] sm:$0xf] }
 0x153   : > { %5076 = vmatprep.subr.mxu0 %v7579_v57  ;;  %5054 = vmatmul.mubr.msk.f32.vlgmr.msra.gmra.mrb[4].mxu1 %vm937_vm2, %v4679_v26 }
 0x154   : > { %5056 = vmatprep.subr.mxu1 %v7579_v57  ;;  %5058 = vmatprep.mubr.msk.f32.mxu1 %vm6434_vm0, %v7579_v57 }
 0x155   : > { %5049 = vmatmul.mubr.msk.f32.vlgmr.msra.gmra.mrb[10].mxu0 %vm937_vm2, %v4676_v62 }
 0x156   : > { %5078 = vmatprep.mubr.msk.f32.mxu0 %vm6434_vm0, %v7579_v57 }
 0x16a   : > { %v788_v6 = vpop.f32.mrb[2].mxu0 }
 0x16b   : > { %v790_v21 = vpop.f32.mrb[3].mxu0  ;;  %5057 = vmatpush3.msk.msra.mxu1 %vm941_vm1, %v788_v6  ;;  %v4694_v6 = vld [vmem:[%s7460_s2 + $0x20] sm:$0xf] }
 0x16c   : > { %5061 = vmatprep.subr.mxu1 %v7579_v57  ;;  %5059 = vmatmul.mubr.msk.f32.vlgmr.msra.gmra.mrb[6].mxu1 %vm937_vm2, %v4682_v51  ;;  %v4691_v51 = vld [vmem:[%s7460_s2 + $0x1c] sm:$0xf] }
 0x16d   : > { %5062 = vmatpush3.msk.msra.mxu1 %vm941_vm1, %v790_v21  ;;  %5063 = vmatprep.mubr.msk.f32.mxu1 %vm6434_vm0, %v7579_v57 }
 0x16e   : > { %5066 = vmatprep.subr.mxu1 %v7579_v57 }
 0x16f   : > { %v859_v26 = vpop.f32.mrb[2].mxu1 }
 0x170   : > { %5064 = vmatmul.mubr.msk.f32.vlgmr.msra.gmra.mrb[8].mxu1 %vm937_vm2, %v4685_v46  ;;  %v861_v62 = vpop.f32.mrb[3].mxu1 }
 0x171   : > { %5068 = vmatprep.mubr.msk.f32.mxu1 %vm6434_vm0, %v7579_v57  ;;  %5067 = vmatpush3.msk.msra.mxu1 %vm941_vm1, %v859_v26 }
 0x172   : > { %5071 = vmatprep.subr.mxu1 %v7579_v57 }
 0x174   : > { %5069 = vmatmul.mubr.msk.f32.vlgmr.msra.gmra.mrb[10].mxu1 %vm937_vm2, %v4688_v60 }
 0x175   : > { %5072 = vmatpush3.msk.msra.mxu1 %vm941_vm1, %v861_v62  ;;  %5073 = vmatprep.mubr.msk.f32.mxu1 %vm6434_vm0, %v7579_v57 }
 0x176   : > { %5709 = vmatprep.subr.bf16.mxu1 %v6624_v4 }
 0x178   : > { %5074 = vmatmul.mubr.msk.f32.vlgmr.msra.gmra.mrb[12].mxu1 %vm937_vm2, %v4691_v51 }
 0x179   : > { %5711 = vmatpush1.bf16.msra.mxu1 %v6626_v8  ;;  %1716 = vmatprep.mubr.f32.mxu1 %v7579_v57 }
 0x17a   : > { %5713 = vmatprep.subr.bf16.mxu1 %v6628_v9 }
 0x17d   : > { %5715 = vmatpush1.bf16.msra.mxu1 %v6632_v14 }
 0x17e   : > { %5717 = vmatprep.subr.bf16.mxu1 %v6635_v15 }
 0x181   : > { %5719 = vmatpush1.bf16.msra.mxu1 %v6638_v24 }
 0x182   : > { %5721 = vmatprep.subr.bf16.mxu1 %v6645_v29 }
 0x185   : > { %5723 = vmatpush1.bf16.msra.mxu1 %v6654_v38 }
 0x186   : > { %5725 = vmatprep.subr.bf16.mxu1 %v6658_v42 }
 0x189   : > { %5727 = vmatpush1.bf16.msra.mxu1 %v6666_v52 }
 0x18a   : > { %v930_v21 = vpop.f32.mrb[4].mxu0  ;;  %5729 = vmatprep.subr.bf16.mxu1 %v6672_v56 }
 0x18b   : > { %v5035_v46 = vpop.f32.mrb[5].mxu0  ;;  %5077 = vmatpush3.msk.msra.mxu0 %vm941_vm1, %v930_v21 }
 0x18c   : > { %5079 = vmatmul.mubr.msk.f32.vlgmr.msra.gmra.mrb[12].mxu0 %vm937_vm2, %v4694_v6  ;;  %5741 = vmatprep.subr.bf16.mxu0 %v6640_v27 }
 0x18d   : > { %5743 = vmatpush1.bf16.msra.mxu0 %v6642_v28  ;;  %5731 = vmatpush1.bf16.msra.mxu1 %v6678_v1 }
 0x18e   : > { %5745 = vmatprep.subr.bf16.mxu0 %v6648_v34  ;;  %5733 = vmatprep.subr.bf16.mxu1 %v6685_v7 }
 0x18f   : > { %1787 = vmatprep.mubr.f32.mxu0 %v7579_v57 }
 0x191   : > { %5747 = vmatpush1.bf16.msra.mxu0 %v6651_v37  ;;  %5735 = vmatpush1.bf16.msra.mxu1 %v6691_v18 }
 0x192   : > { %5749 = vmatprep.subr.bf16.mxu0 %v6660_v45  ;;  %5737 = vmatprep.subr.bf16.mxu1 %v6702_v23  ;;  %v1648_v23 = vpop.permute.xlu0 %1647 }
 0x195   : > { %5751 = vmatpush1.bf16.msra.mxu0 %v6663_v50  ;;  %5739 = vmatpush1.bf16.msra.mxu1 %v6708_v35 }
 0x196   : > { %5753 = vmatprep.subr.bf16.mxu0 %v6669_v53  ;;  %5773 = vmatprep.subr.bf16.mxu1 %v6718_v43 }
 0x199   : > { %5755 = vmatpush1.bf16.msra.mxu0 %v6675_v63 }
 0x19a   : > { %5757 = vmatprep.subr.bf16.mxu0 %v6682_v3 }
 0x19d   : > { %5759 = vmatpush1.bf16.msra.mxu0 %v6688_v17 }
 0x19e   : > { %5761 = vmatprep.subr.bf16.mxu0 %v6699_v20 }
 0x1a1   : > { %5763 = vmatpush1.bf16.msra.mxu0 %v6705_v33 }
 0x1a2   : > { %5765 = vmatprep.subr.bf16.mxu0 %v6715_v39 }
 0x1a5   : > { %5767 = vmatpush1.bf16.msra.mxu0 %v6723_v54 }
 0x1a6   : > { %5769 = vmatprep.subr.bf16.mxu0 %v6729_v58 }
 0x1a9   : > { %5771 = vmatpush1.bf16.msra.mxu0 %v6736_v11 }
 0x1aa   : > { %5805 = vmatprep.subr.bf16.mxu0 %v6742_v16 }
 0x220   : > { %v1011_v26 = vpop.f32.mrb[6].mxu0 }
 0x221   : > { %v5040_v60 = vpop.f32.mrb[7].mxu0 }
 0x224   : > { %v1087_v62 = vpop.f32.mrb[8].mxu0 }
 0x225   : > { %v1088_v51 = vadd.f32 %v1087_v62, %v1011_v26  ;;  %v5045_v6 = vpop.f32.mrb[9].mxu0 }
 0x226   : > { %v1244_v21 = vpop.f32.mrb[4].mxu1 }
 0x227   : > { %v5055_v19 = vpop.f32.mrb[5].mxu1 }
 0x228   : > { %v1165_v46 = vpop.f32.mrb[10].mxu0 }
 0x229   : > { %v1169_v20 = vadd.f32 %v1165_v46, %v1088_v51  ;;  %v5050_v33 = vpop.f32.mrb[11].mxu0  ;;  %v7599_v46 = vld [vmem:[#allocation47_spill] sm:$0xff] }
 0x22a   : > { %v7590_v33 = vld [vmem:[#allocation37_spill] sm:$0xff] }
 0x22b   : > { %v1248_v17 = vadd.f32 %v1244_v21, %v1169_v20  ;;  %v7588_v20 = vld [vmem:[#allocation40_spill] sm:$0xff]  ;;  %v7598_v21 = vld [vmem:[#allocation46_spill] sm:$0xff] }
 0x23f   : > { %v1323_v39 = vpop.f32.mrb[6].mxu1 }
 0x240   : > { %v1327_v3 = vadd.f32 %v1323_v39, %v1248_v17  ;;  %v5060_v54 = vpop.f32.mrb[7].mxu1  ;;  %v7587_v17 = vld [vmem:[#allocation34_spill] sm:$0xff]  ;;  %v7592_v39 = vld [vmem:[#allocation41_spill] sm:$0xff] }
 0x241   : > { %v7594_v54 = vld [vmem:[#allocation43_spill] sm:$0xff] }
 0x243   : > { %v1402_v63 = vpop.f32.mrb[8].mxu1 }
 0x244   : > { %v1406_v58 = vadd.f32 %v1402_v63, %v1327_v3  ;;  %v5065_v43 = vpop.f32.mrb[9].mxu1  ;;  %v7585_v63 = vld [vmem:[#allocation33_spill] sm:$0xff]  ;;  %v7586_v3 = vld [vmem:[#allocation38_spill] sm:$0xff] }
 0x245   : > { %v7593_v43 = vld [vmem:[#allocation42_spill] sm:$0xff] }
 0x247   : > { %v1481_v11 = vpop.f32.mrb[10].mxu1 }
 0x248   : > { %v1485_v53 = vadd.f32 %v1481_v11, %v1406_v58  ;;  %v5070_v16 = vpop.f32.mrb[11].mxu1  ;;  %v7595_v58 = vld [vmem:[#allocation45_spill] sm:$0xff]  ;;  %v7596_v11 = vmov 0.0|0.0  }
 0x249   : > { %v7597_v16 = vld [vmem:[#allocation44_spill] sm:$0xff] }
 0x24b   : > { %v1560_v35 = vpop.f32.mrb[12].mxu1 }
 0x24c   : > { %v1564_v60 = vadd.f32 %v1560_v35, %v1485_v53  ;;  %v5075_v50 = vpop.f32.mrb[13].mxu1  ;;  %v7584_v53 = vld [vmem:[#allocation36_spill] sm:$0xff]  ;;  %v7591_v35 = vld [vmem:[#allocation39_spill] sm:$0xff] }
 0x24d   : > { %v7583_v50 = vld [vmem:[#allocation32_spill] sm:$0xff] }
 0x25f   : > { %v1639_v26 = vpop.f32.mrb[12].mxu0 }
 0x260   : > { %v1643_v62 = vadd.f32 %v1639_v26, %v1564_v60  ;;  %v5080_v6 = vpop.f32.mrb[13].mxu0  ;;  %v7600_v60 = vld [vmem:[#allocation48_spill] sm:$0xff] }
 0x261   : > { %v4697_v6 = vld [vmem:[%s7462_s4 + $0x8] sm:$0xff] }
 0x262   : > { %v1650_v19 = vadd.f32 %v1648_v23, %v1643_v62  ;;  %v7589_v23 = vld [vmem:[#allocation35_spill] sm:$0xff] }
 0x264   : > { %v1651_v51 = vmax.f32 %v1650_v19, 0.0 }
 0x266   : > { %1717 = vmatmul.mubr.f32.vlgmr.msra.gmra.mrb[14].mxu1 %v1651_v51  ;;  %1788 = vmatmul.mubr.f32.vlgmr.msra.gmra.mrb[14].mxu0 %v1651_v51 }
 0x267   : > { %5775 = vmatpush1.bf16.msra.mxu1 %v6726_v55  ;;  %5807 = vmatpush1.bf16.msra.mxu0 %v6749_v36 }
 0x268   : > { %5777 = vmatprep.subr.bf16.mxu1 %v6732_v61  ;;  %5809 = vmatprep.subr.bf16.mxu0 %v6755_v44 }
 0x269   : > { %1858 = vmatprep.mubr.f32.mxu1 %v7579_v57  ;;  %1929 = vmatprep.mubr.f32.mxu0 %v7579_v57 }
 0x26b   : > { %5779 = vmatpush1.bf16.msra.mxu1 %v6739_v12  ;;  %5811 = vmatpush1.bf16.msra.mxu0 %v6762_v2 }
 0x26c   : > { %5781 = vmatprep.subr.bf16.mxu1 %v6745_v22  ;;  %5813 = vmatprep.subr.bf16.mxu0 %v6769_v10 }
 0x26f   : > { %5783 = vmatpush1.bf16.msra.mxu1 %v7583_v50  ;;  %5815 = vmatpush1.bf16.msra.mxu0 %v7584_v53 }
 0x270   : > { %5785 = vmatprep.subr.bf16.mxu1 %v7585_v63  ;;  %5817 = vmatprep.subr.bf16.mxu0 %v7586_v3 }
 0x273   : > { %5787 = vmatpush1.bf16.msra.mxu1 %v7587_v17  ;;  %5819 = vmatpush1.bf16.msra.mxu0 %v7588_v20 }
 0x274   : > { %5789 = vmatprep.subr.bf16.mxu1 %v7589_v23  ;;  %5821 = vmatprep.subr.bf16.mxu0 %v6793_v30 }
 0x277   : > { %5791 = vmatpush1.bf16.msra.mxu1 %v7590_v33  ;;  %5823 = vmatpush1.bf16.msra.mxu0 %v6799_v47 }
 0x278   : > { %5793 = vmatprep.subr.bf16.mxu1 %v7591_v35  ;;  %5825 = vmatprep.subr.bf16.mxu0 %v6805_v48 }
 0x27b   : > { %5795 = vmatpush1.bf16.msra.mxu1 %v6790_v25  ;;  %5827 = vmatpush1.bf16.msra.mxu0 %v6811_v31 }
 0x27c   : > { %5797 = vmatprep.subr.bf16.mxu1 %v7592_v39  ;;  %5829 = vmatprep.subr.bf16.mxu0 %v6817_v40 }
 0x27f   : > { %5799 = vmatpush1.bf16.msra.mxu1 %v7593_v43  ;;  %5831 = vmatpush1.bf16.msra.mxu0 %v6821_v13 }
 0x280   : > { %5801 = vmatprep.subr.bf16.mxu1 %v7594_v54  ;;  %5833 = vmatprep.subr.bf16.mxu0 %v6827_v0 }
 0x283   : > { %5803 = vmatpush1.bf16.msra.mxu1 %v6814_v5  ;;  %5835 = vmatpush1.bf16.msra.mxu0 %v7595_v58 }
 0x284   : > { %5836 = vmatprep.subr.bf16.mxu1 %v7596_v11  ;;  %5116 = vmatprep.subr.mxu0 %v7579_v57 }
 0x286   : > { %1859 = vmatmul.mubr.f32.vlgmr.msra.gmra.mrb[16].mxu1 %v1651_v51  ;;  %1930 = vmatmul.mubr.f32.vlgmr.msra.gmra.mrb[16].mxu0 %v1651_v51 }
 0x287   : > { %5838 = vmatpush3.bf16.msra.mxu1 %v7597_v16  ;;  %5113 = vmatprep.mubr.msk.f32.mxu1 %vm6434_vm0, %v7579_v57 }
 0x288   : > { %5839 = vmatprep.subr.bf16.mxu1 %v7596_v11  ;;  %5118 = vmatprep.mubr.msk.f32.mxu0 %vm6434_vm0, %v7579_v57 }
 0x28b   : > { %5841 = vmatpush3.bf16.msra.mxu1 %v7598_v21 }
 0x28c   : > { %5842 = vmatprep.subr.bf16.mxu1 %v7596_v11 }
 0x28f   : > { %5844 = vmatpush3.bf16.msra.mxu1 %v7599_v46 }
 0x290   : > { %5845 = vmatprep.subr.bf16.mxu1 %v7596_v11 }
 0x293   : > { %5847 = vmatpush3.bf16.msra.mxu1 %v7600_v60 }
 0x294   : > { %5848 = vmatprep.subr.bf16.mxu1 %v7596_v11 }
 0x297   : > { %5850 = vmatpush3.bf16.msra.mxu1 %v6855_v32 }
 0x298   : > { %5851 = vmatprep.subr.bf16.mxu1 %v7596_v11 }
 0x29b   : > { %5853 = vmatpush3.bf16.msra.mxu1 %v6859_v41 }
 0x29c   : > { %5854 = vmatprep.subr.bf16.mxu1 %v7596_v11 }
 0x29f   : > { %5856 = vmatpush3.bf16.msra.mxu1 %v6863_v59 }
 0x2a0   : > { %5857 = vmatprep.subr.bf16.mxu1 %v7596_v11 }
 0x2a3   : > { %5859 = vmatpush3.bf16.msra.mxu1 %v6867_v49 }
 0x2a4   : > { %5156 = vmatprep.subr.mxu1 %v7579_v57 }
 0x2a6   : > { %5114 = vmatmul.mubr.f32.vlgmr.msra.gmra.mrb[18].mxu1 %v1651_v51  ;;  %v2006_v51 = vld [vmem:[%s7462_s4] sm:$0xff] }
 0x2a7   : > { %5158 = vmatprep.mubr.msk.f32.mxu1 %vm6434_vm0, %v7579_v57 }
 0x339   : > { %v1718_v26 = vpop.f32.mrb[14].mxu1  ;;  %v1789_v62 = vpop.f32.mrb[14].mxu0 }
 0x33a   : > { %v1720_v19 = vpop.f32.mrb[15].mxu1  ;;  %v1791_v59 = vpop.f32.mrb[15].mxu0 }
 0x33b   : > { %5117 = vmatpush3.msk.msra.mxu0 %vm2013_vm3, %v1720_v19 }
 0x33c   : > { %5119 = vmatmul.mubr.msk.f32.vlgmr.msra.gmra.mrb[18].mxu0 %vm2009_vm4, %v4697_v6  ;;  %5121 = vmatprep.subr.mxu0 %v7579_v57  ;;  %v4708_v6 = vld [vmem:[%s7462_s4 + $0x20] sm:$0xff] }
 0x33d   : > { %5122 = vmatpush3.msk.msra.mxu0 %vm2013_vm3, %v1718_v26  ;;  %5123 = vmatprep.mubr.msk.f32.mxu0 %vm6434_vm0, %v7579_v57  ;;  %v4702_v26 = vld [vmem:[%s7462_s4 + $0x10] sm:$0xff] }
 0x33e   : > { %5126 = vmatprep.subr.mxu0 %v7579_v57 }
 0x340   : > { %5124 = vmatmul.mubr.msk.f32.vlgmr.msra.gmra.mrb[20].mxu0 %vm2009_vm4, %v2006_v51 }
 0x341   : > { %5127 = vmatpush3.msk.msra.mxu0 %vm2013_vm3, %v1789_v62  ;;  %5128 = vmatprep.mubr.msk.f32.mxu0 %vm6434_vm0, %v7579_v57  ;;  %v4705_v62 = vld [vmem:[%s7462_s4 + $0x18] sm:$0xff] }
 0x342   : > { %5131 = vmatprep.subr.mxu0 %v7579_v57 }
 0x344   : > { %5129 = vmatmul.mubr.msk.f32.vlgmr.msra.gmra.mrb[22].mxu0 %vm2009_vm4, %v4702_v26 }
 0x345   : > { %5132 = vmatpush3.msk.msra.mxu0 %vm2013_vm3, %v1791_v59  ;;  %5133 = vmatprep.mubr.msk.f32.mxu0 %vm6434_vm0, %v7579_v57 }
 0x346   : > { %5136 = vmatprep.subr.mxu0 %v7579_v57 }
 0x348   : > { %5134 = vmatmul.mubr.msk.f32.vlgmr.msra.gmra.mrb[24].mxu0 %vm2009_vm4, %v4705_v62  ;;  %v4711_v62 = vld [vmem:[%s7462_s4 + $0x28] sm:$0xff] }
 0x349   : > { %5138 = vmatprep.mubr.msk.f32.mxu0 %vm6434_vm0, %v7579_v57 }
 0x359   : > { %v1860_v19 = vpop.f32.mrb[16].mxu1  ;;  %v1931_v59 = vpop.f32.mrb[16].mxu0 }
 0x35a   : > { %v1862_v51 = vpop.f32.mrb[17].mxu1  ;;  %v1933_v26 = vpop.f32.mrb[17].mxu0  ;;  %5137 = vmatpush3.msk.msra.mxu0 %vm2013_vm3, %v1860_v19  ;;  %v4717_v19 = vld [vmem:[%s7462_s4 + $0x38] sm:$0xff] }
 0x35b   : > { %5139 = vmatmul.mubr.msk.f32.vlgmr.msra.gmra.mrb[26].mxu0 %vm2009_vm4, %v4708_v6  ;;  %5141 = vmatprep.subr.mxu0 %v7579_v57  ;;  %v4714_v6 = vld [vmem:[%s7462_s4 + $0x30] sm:$0xff] }
 0x35c   : > { %5142 = vmatpush3.msk.msra.mxu0 %vm2013_vm3, %v1862_v51  ;;  %5143 = vmatprep.mubr.msk.f32.mxu0 %vm6434_vm0, %v7579_v57 }
 0x35d   : > { %5146 = vmatprep.subr.mxu0 %v7579_v57 }
 0x35f   : > { %5144 = vmatmul.mubr.msk.f32.vlgmr.msra.gmra.mrb[28].mxu0 %vm2009_vm4, %v4711_v62 }
 0x360   : > { %5147 = vmatpush3.msk.msra.mxu0 %vm2013_vm3, %v1931_v59  ;;  %5148 = vmatprep.mubr.msk.f32.mxu0 %vm6434_vm0, %v7579_v57 }
 0x361   : > { %5151 = vmatprep.subr.mxu0 %v7579_v57 }
 0x363   : > { %5149 = vmatmul.mubr.msk.f32.vlgmr.msra.gmra.mrb[30].mxu0 %vm2009_vm4, %v4714_v6 }
 0x364   : > { %5152 = vmatpush3.msk.msra.mxu0 %vm2013_vm3, %v1933_v26  ;;  %5153 = vmatprep.mubr.msk.f32.mxu0 %vm6434_vm0, %v7579_v57 }
 0x365   : > { %5861 = vmatprep.subr.bf16.mxu0 %v6624_v4  ;;  %v4720_v4 = vld [vmem:[%s7462_s4 + $0x40] sm:$0xff] }
 0x367   : > { %5154 = vmatmul.mubr.msk.f32.vlgmr.msra.gmra.mrb[32].mxu0 %vm2009_vm4, %v4717_v19 }
 0x368   : > { %5863 = vmatpush1.bf16.msra.mxu0 %v6626_v8  ;;  %2788 = vmatprep.mubr.f32.mxu0 %v7579_v57 }
 0x369   : > { %5865 = vmatprep.subr.bf16.mxu0 %v6628_v9 }
 0x36c   : > { %5867 = vmatpush1.bf16.msra.mxu0 %v6632_v14  ;;  %v7601_v14 = vld [vmem:[#allocation23_spill] sm:$0xff] }
 0x36d   : > { %5869 = vmatprep.subr.bf16.mxu0 %v6635_v15  ;;  %v7602_v15 = vld [vmem:[#allocation17_spill] sm:$0xff] }
 0x370   : > { %5871 = vmatpush1.bf16.msra.mxu0 %v6638_v24  ;;  %v7603_v24 = vld [vmem:[#allocation25_spill] sm:$0xff] }
 0x371   : > { %5873 = vmatprep.subr.bf16.mxu0 %v6645_v29  ;;  %v7606_v29 = vld [vmem:[#allocation19_spill] sm:$0xff] }
 0x374   : > { %5875 = vmatpush1.bf16.msra.mxu0 %v6654_v38  ;;  %v7608_v38 = vld [vmem:[#allocation21_spill] sm:$0xff] }
 0x375   : > { %5877 = vmatprep.subr.bf16.mxu0 %v6658_v42  ;;  %v7610_v42 = vld [vmem:[#allocation24_spill] sm:$0xff] }
 0x378   : > { %5879 = vmatpush1.bf16.msra.mxu0 %v6666_v52  ;;  %v7612_v52 = vld [vmem:[#allocation28_spill] sm:$0xff] }
 0x379   : > { %v2002_v8 = vpop.f32.mrb[18].mxu1  ;;  %5881 = vmatprep.subr.bf16.mxu0 %v6672_v56  ;;  %v7613_v56 = vld [vmem:[#allocation29_spill] sm:$0xff] }
 0x37a   : > { %v5115_v9 = vpop.f32.mrb[19].mxu1  ;;  %5157 = vmatpush3.msk.msra.mxu1 %vm2013_vm3, %v2002_v8 }
 0x37b   : > { %5159 = vmatmul.mubr.msk.f32.vlgmr.msra.gmra.mrb[20].mxu1 %vm2009_vm4, %v4720_v4  ;;  %5893 = vmatprep.subr.bf16.mxu1 %v6640_v27  ;;  %v7604_v27 = vld [vmem:[#allocation18_spill] sm:$0xff] }
 0x37c   : > { %5895 = vmatpush1.bf16.msra.mxu1 %v6642_v28  ;;  %5883 = vmatpush1.bf16.msra.mxu0 %v6678_v1  ;;  %v7605_v28 = vld [vmem:[#allocation27_spill] sm:$0xff]  ;;  %v7614_v1 = vld [vmem:[#allocation30_spill] sm:$0xff] }
 0x37d   : > { %5897 = vmatprep.subr.bf16.mxu1 %v6648_v34  ;;  %5885 = vmatprep.subr.bf16.mxu0 %v6685_v7  ;;  %v7607_v34 = vld [vmem:[#allocation20_spill] sm:$0xff]  ;;  %v7615_v7 = vld [vmem:[#allocation31_spill] sm:$0xff] }
 0x37e   : > { %2859 = vmatprep.mubr.f32.mxu1 %v7579_v57 }
 0x380   : > { %5899 = vmatpush1.bf16.msra.mxu1 %v6651_v37  ;;  %5887 = vmatpush1.bf16.msra.mxu0 %v6691_v18  ;;  %v7609_v37 = vld [vmem:[#allocation22_spill] sm:$0xff] }
 0x381   : > { %5901 = vmatprep.subr.bf16.mxu1 %v6660_v45  ;;  %5889 = vmatprep.subr.bf16.mxu0 %v7601_v14  ;;  %v7611_v45 = vld [vmem:[#allocation26_spill] sm:$0xff] }
 0x384   : > { %5903 = vmatpush1.bf16.msra.mxu1 %v7602_v15  ;;  %5891 = vmatpush1.bf16.msra.mxu0 %v7603_v24 }
 0x385   : > { %5905 = vmatprep.subr.bf16.mxu1 %v7604_v27  ;;  %5925 = vmatprep.subr.bf16.mxu0 %v7605_v28 }
 0x388   : > { %5907 = vmatpush1.bf16.msra.mxu1 %v7606_v29 }
 0x389   : > { %5909 = vmatprep.subr.bf16.mxu1 %v7607_v34 }
 0x38c   : > { %5911 = vmatpush1.bf16.msra.mxu1 %v7608_v38 }
 0x38d   : > { %5913 = vmatprep.subr.bf16.mxu1 %v7609_v37 }
 0x390   : > { %5915 = vmatpush1.bf16.msra.mxu1 %v7610_v42 }
 0x391   : > { %5917 = vmatprep.subr.bf16.mxu1 %v7611_v45 }
 0x394   : > { %5919 = vmatpush1.bf16.msra.mxu1 %v7612_v52 }
 0x395   : > { %5921 = vmatprep.subr.bf16.mxu1 %v7613_v56 }
 0x398   : > { %5923 = vmatpush1.bf16.msra.mxu1 %v7614_v1 }
 0x399   : > { %5957 = vmatprep.subr.bf16.mxu1 %v7615_v7 }
 0x40f   : > { %v2083_v18 = vpop.f32.mrb[18].mxu0 }
 0x410   : > { %v5120_v59 = vpop.f32.mrb[19].mxu0 }
 0x411   : > { %v2720_v59 = vpop.permute.xlu0 %2719 }
 0x413   : > { %v2159_v51 = vpop.f32.mrb[20].mxu0 }
 0x414   : > { %v2160_v26 = vadd.f32 %v2159_v51, %v2083_v18  ;;  %v5125_v62 = vpop.f32.mrb[21].mxu0 }
 0x415   : > { %v3790_v62 = vld [vmem:[#allocation5 + $0xa8] sm:$0xff] }
 0x417   : > { %v2237_v6 = vpop.f32.mrb[22].mxu0 }
 0x418   : > { %v2241_v19 = vadd.f32 %v2237_v6, %v2160_v26  ;;  %v5130_v4 = vpop.f32.mrb[23].mxu0  ;;  %v3774_v6 = vld [vmem:[#allocation5 + $0x30] sm:$0xff] }
 0x419   : > { %v3775_v4 = vld [vmem:[#allocation5 + $0x38] sm:$0xff] }
 0x41b   : > { %v2316_v8 = vpop.f32.mrb[24].mxu0 }
 0x41c   : > { %v2320_v9 = vadd.f32 %v2316_v8, %v2241_v19  ;;  %v5135_v14 = vpop.f32.mrb[25].mxu0  ;;  %v3791_v8 = vld [vmem:[#allocation5 + $0xb0] sm:$0xff] }
 0x41d   : > { %v6046_v14 = vpack.c.bf16 %v3775_v4, %v3774_v6  ;;  %v3946_v6 = vld [vmem:[#allocation5 + $0x108] sm:$0xff] }
 0x42e   : > { %v2395_v15 = vpop.f32.mrb[26].mxu0 }
 0x42f   : > { %v2399_v24 = vadd.f32 %v2395_v15, %v2320_v9  ;;  %v5140_v27 = vpop.f32.mrb[27].mxu0  ;;  %v3792_v9 = vld [vmem:[#allocation5 + $0xb8] sm:$0xff]  ;;  %v3776_v15 = vld [vmem:[#allocation5 + $0x40] sm:$0xff] }
 0x430   : > { %v6022_v27 = vpack.c.bf16 %v3792_v9, %v3791_v8  ;;  %v4037_v8 = vld [vmem:[#allocation5 + $0x190] sm:$0xff]  ;;  %v4038_v9 = vld [vmem:[#allocation5 + $0x198] sm:$0xff] }
 0x432   : > { %v2474_v28 = vpop.f32.mrb[28].mxu0 }
 0x433   : > { %v2478_v29 = vadd.f32 %v2474_v28, %v2399_v24  ;;  %v5145_v34 = vpop.f32.mrb[29].mxu0  ;;  %v3777_v24 = vld [vmem:[#allocation5 + $0x48] sm:$0xff] }
 0x434   : > { %v6049_v28 = vpack.c.bf16 %v3777_v24, %v3776_v15  ;;  %v3794_v34 = vld [vmem:[#allocation5 + $0xc8] sm:$0xff]  ;;  %v3947_v24 = vld [vmem:[#allocation5 + $0x110] sm:$0xff] }
 0x436   : > { %v2553_v38 = vpop.f32.mrb[30].mxu0 }
 0x437   : > { %v2557_v37 = vadd.f32 %v2553_v38, %v2478_v29  ;;  %v5150_v42 = vpop.f32.mrb[31].mxu0  ;;  %v3793_v29 = vld [vmem:[#allocation5 + $0xc0] sm:$0xff]  ;;  %v3778_v38 = vld [vmem:[#allocation5 + $0x50] sm:$0xff] }
 0x438   : > { %v6025_v42 = vpack.c.bf16 %v3794_v34, %v3793_v29  ;;  %v4039_v29 = vld [vmem:[#allocation5 + $0x1a0] sm:$0xff]  ;;  %v4040_v34 = vld [vmem:[#allocation5 + $0x1a8] sm:$0xff] }
 0x43a   : > { %v2632_v45 = vpop.f32.mrb[32].mxu0 }
 0x43b   : > { %v2636_v52 = vadd.f32 %v2632_v45, %v2557_v37  ;;  %v5155_v56 = vpop.f32.mrb[33].mxu0  ;;  %v3779_v37 = vld [vmem:[#allocation5 + $0x58] sm:$0xff] }
 0x43c   : > { %v6052_v45 = vpack.c.bf16 %v3779_v37, %v3778_v38  ;;  %v3796_v56 = vld [vmem:[#allocation5 + $0xd8] sm:$0xff]  ;;  %v3949_v37 = vld [vmem:[#allocation5 + $0x120] sm:$0xff] }
 0x44e   : > { %v2711_v1 = vpop.f32.mrb[20].mxu1 }
 0x44f   : > { %v2715_v7 = vadd.f32 %v2711_v1, %v2636_v52  ;;  %v5160_v18 = vpop.f32.mrb[21].mxu1  ;;  %v3795_v52 = vld [vmem:[#allocation5 + $0xd0] sm:$0xff]  ;;  %v3780_v1 = vld [vmem:[#allocation5 + $0x60] sm:$0xff] }
 0x450   : > { %v6028_v18 = vpack.c.bf16 %v3796_v56, %v3795_v52  ;;  %v4041_v52 = vld [vmem:[#allocation5 + $0x1b0] sm:$0xff]  ;;  %v4042_v56 = vld [vmem:[#allocation5 + $0x1b8] sm:$0xff] }
 0x451   : > { %v2722_v51 = vadd.f32 %v2720_v59, %v2715_v7  ;;  %v3781_v7 = vld [vmem:[#allocation5 + $0x68] sm:$0xff] }
 0x452   : > { %v6055_v59 = vpack.c.bf16 %v3781_v7, %v3780_v1  ;;  %v3951_v7 = vld [vmem:[#allocation5 + $0x130] sm:$0xff] }
 0x453   : > { %v2723_v26 = vmax.f32 %v2722_v51, 0.0  ;;  %v3797_v51 = vld [vmem:[#allocation5 + $0xe0] sm:$0xff] }
 0x455   : > { %2789 = vmatmul.mubr.f32.vlgmr.msra.gmra.mrb[34].mxu0 %v2723_v26  ;;  %2860 = vmatmul.mubr.f32.vlgmr.msra.gmra.mrb[22].mxu1 %v2723_v26 }
 0x456   : > { %5927 = vmatpush1.bf16.msra.mxu0 %v6726_v55  ;;  %5959 = vmatpush1.bf16.msra.mxu1 %v6749_v36  ;;  %v7616_v55 = vld [vmem:[#allocation49_spill] sm:$0xff] }
 0x457   : > { %5929 = vmatprep.subr.bf16.mxu0 %v6732_v61  ;;  %5961 = vmatprep.subr.bf16.mxu1 %v6755_v44  ;;  %v3760_v61 = vld [vmem:[%s7465_s7] sm:$0xff]  ;;  %v4723_v36 = vld [vmem:[%s7464_s6 + $0x8] sm:$0xff] }
 0x458   : > { %2930 = vmatprep.mubr.f32.mxu0 %v7579_v57  ;;  %3001 = vmatprep.mubr.f32.mxu1 %v7579_v57 }
 0x459   : > { %3763 = vperm.xlu1 %6297, %v3760_v61   ;;  %v3782_v61 = vld [vmem:[#allocation5 + $0x70] sm:$0xff] }
 0x45a   : > { %5931 = vmatpush1.bf16.msra.mxu0 %v6739_v12  ;;  %5963 = vmatpush1.bf16.msra.mxu1 %v6762_v2 }
 0x45b   : > { %5933 = vmatprep.subr.bf16.mxu0 %v6745_v22  ;;  %5965 = vmatprep.subr.bf16.mxu1 %v6769_v10  ;;  %v3078_v10 = vld [vmem:[%s7464_s6] sm:$0xff] }
 0x45e   : > { %5935 = vmatpush1.bf16.msra.mxu0 %v7583_v50  ;;  %5967 = vmatpush1.bf16.msra.mxu1 %v7584_v53  ;;  %v3768_v53 = vld [vmem:[#allocation5] sm:$0xff] }
 0x45f   : > { %5937 = vmatprep.subr.bf16.mxu0 %v7585_v63  ;;  %5969 = vmatprep.subr.bf16.mxu1 %v7586_v3  ;;  %v3769_v63 = vld [vmem:[#allocation5 + $0x8] sm:$0xff] }
 0x460   : > { %v6037_v3 = vpack.c.bf16 %v3769_v63, %v3768_v53 }
 0x462   : > { %5939 = vmatpush1.bf16.msra.mxu0 %v7587_v17  ;;  %5971 = vmatpush1.bf16.msra.mxu1 %v7588_v20  ;;  %v3785_v17 = vld [vmem:[#allocation5 + $0x80] sm:$0xff]  ;;  %v3786_v20 = vld [vmem:[#allocation5 + $0x88] sm:$0xff] }
 0x463   : > { %5941 = vmatprep.subr.bf16.mxu0 %v7589_v23  ;;  %5973 = vmatprep.subr.bf16.mxu1 %v6793_v30  ;;  %v4728_v30 = vld [vmem:[%s7464_s6 + $0x18] sm:$0xff]  ;;  %v6013_v23 = vpack.c.bf16 %v3786_v20, %v3785_v17 }
 0x466   : > { %5943 = vmatpush1.bf16.msra.mxu0 %v7590_v33  ;;  %5975 = vmatpush1.bf16.msra.mxu1 %v6799_v47  ;;  %v4730_v47 = vld [vmem:[%s7464_s6 + $0x20] sm:$0xff]  ;;  %v3770_v33 = vld [vmem:[#allocation5 + $0x10] sm:$0xff] }
 0x467   : > { %5945 = vmatprep.subr.bf16.mxu0 %v7591_v35  ;;  %5977 = vmatprep.subr.bf16.mxu1 %v6805_v48  ;;  %v3771_v35 = vld [vmem:[#allocation5 + $0x18] sm:$0xff] }
 0x46a   : > { %5947 = vmatpush1.bf16.msra.mxu0 %v6790_v25  ;;  %5979 = vmatpush1.bf16.msra.mxu1 %v6811_v31  ;;  %v4726_v25 = vld [vmem:[%s7464_s6 + $0x10] sm:$0xff] }
 0x46b   : > { %5949 = vmatprep.subr.bf16.mxu0 %v7592_v39  ;;  %5981 = vmatprep.subr.bf16.mxu1 %v6817_v40  ;;  %v6040_v39 = vpack.c.bf16 %v3771_v35, %v3770_v33 }
 0x46e   : > { %5951 = vmatpush1.bf16.msra.mxu0 %v7593_v43  ;;  %5983 = vmatpush1.bf16.msra.mxu1 %v6821_v13  ;;  %v4732_v13 = vld [vmem:[%s7464_s6 + $0x28] sm:$0xff]  ;;  %v3787_v43 = vld [vmem:[#allocation5 + $0x90] sm:$0xff] }
 0x46f   : > { %5953 = vmatprep.subr.bf16.mxu0 %v7594_v54  ;;  %5985 = vmatprep.subr.bf16.mxu1 %v6827_v0  ;;  %v4734_v0 = vld [vmem:[%s7464_s6 + $0x30] sm:$0xff]  ;;  %v3788_v54 = vld [vmem:[#allocation5 + $0x98] sm:$0xff] }
 0x472   : > { %5955 = vmatpush1.bf16.msra.mxu0 %v6814_v5  ;;  %5987 = vmatpush1.bf16.msra.mxu1 %v7595_v58  ;;  %v6016_v58 = vpack.c.bf16 %v3788_v54, %v3787_v43 }
 0x473   : > { %5988 = vmatprep.subr.bf16.mxu0 %v7596_v11  ;;  %5196 = vmatprep.subr.mxu1 %v7579_v57 }
 0x475   : > { %2931 = vmatmul.mubr.f32.vlgmr.msra.gmra.mrb[36].mxu0 %v2723_v26  ;;  %3002 = vmatmul.mubr.f32.vlgmr.msra.gmra.mrb[24].mxu1 %v2723_v26 }
 0x476   : > { %5990 = vmatpush3.bf16.msra.mxu0 %v7597_v16  ;;  %5193 = vmatprep.mubr.msk.f32.mxu0 %vm6434_vm0, %v7579_v57  ;;  %v3772_v16 = vld [vmem:[#allocation5 + $0x20] sm:$0xff] }
 0x477   : > { %5991 = vmatprep.subr.bf16.mxu0 %v7596_v11  ;;  %5198 = vmatprep.mubr.msk.f32.mxu1 %vm6434_vm0, %v7579_v57 }
 0x47a   : > { %5993 = vmatpush3.bf16.msra.mxu0 %v7598_v21  ;;  %v3773_v21 = vld [vmem:[#allocation5 + $0x28] sm:$0xff] }
 0x47b   : > { %5994 = vmatprep.subr.bf16.mxu0 %v7596_v11 }
 0x47e   : > { %5996 = vmatpush3.bf16.msra.mxu0 %v7599_v46  ;;  %v6043_v46 = vpack.c.bf16 %v3773_v21, %v3772_v16  ;;  %v4035_v21 = vld [vmem:[#allocation5 + $0x180] sm:$0xff] }
 0x47f   : > { %5997 = vmatprep.subr.bf16.mxu0 %v7596_v11 }
 0x482   : > { %5999 = vmatpush3.bf16.msra.mxu0 %v7600_v60  ;;  %v3789_v60 = vld [vmem:[#allocation5 + $0xa0] sm:$0xff] }
 0x483   : > { %6000 = vmatprep.subr.bf16.mxu0 %v7596_v11  ;;  %v6019_v19 = vpack.c.bf16 %v3790_v62, %v3789_v60  ;;  %v3945_v62 = vld [vmem:[#allocation5 + $0x100] sm:$0xff] }
 0x486   : > { %6002 = vmatpush3.bf16.msra.mxu0 %v6855_v32 }
 0x487   : > { %6003 = vmatprep.subr.bf16.mxu0 %v7596_v11 }
 0x48a   : > { %6005 = vmatpush3.bf16.msra.mxu0 %v6859_v41  ;;  %v4736_v41 = vld [vmem:[%s7464_s6 + $0x38] sm:$0xff] }
 0x48b   : > { %6006 = vmatprep.subr.bf16.mxu0 %v7596_v11 }
 0x48e   : > { %6008 = vmatpush3.bf16.msra.mxu0 %v7616_v55 }
 0x48f   : > { %6009 = vmatprep.subr.bf16.mxu0 %v7596_v11 }
 0x492   : > { %6011 = vmatpush3.bf16.msra.mxu0 %v6867_v49  ;;  %v4738_v49 = vld [vmem:[%s7464_s6 + $0x40] sm:$0xff] }
 0x493   : > { %5236 = vmatprep.subr.mxu0 %v7579_v57 }
 0x495   : > { %5194 = vmatmul.mubr.f32.vlgmr.msra.gmra.mrb[38].mxu0 %v2723_v26  ;;  %v3798_v26 = vld [vmem:[#allocation5 + $0xe8] sm:$0xff] }
 0x496   : > { %5238 = vmatprep.mubr.msk.f32.mxu0 %vm6434_vm0, %v7579_v57  ;;  %v6031_v55 = vpack.c.bf16 %v3798_v26, %v3797_v51  ;;  %v4043_v51 = vld [vmem:[#allocation5 + $0x1c0] sm:$0xff]  ;;  %v4044_v26 = vld [vmem:[#allocation5 + $0x1c8] sm:$0xff] }
 0x4d8   : > { %v3764_v54 = vpop.permute.xlu1 %3763 }
 0x528   : > { %v2790_v12 = vpop.f32.mrb[34].mxu0  ;;  %v2861_v22 = vpop.f32.mrb[22].mxu1 }
 0x529   : > { %v2792_v44 = vpop.f32.mrb[35].mxu0  ;;  %v2863_v2 = vpop.f32.mrb[23].mxu1 }
 0x52a   : > { %5197 = vmatpush3.msra.mxu1 %v2792_v44  ;;  %v3800_v44 = vld [vmem:[#allocation5 + $0xf8] sm:$0xff] }
 0x52b   : > { %5199 = vmatmul.mubr.msk.f32.vlgmr.msra.gmra.mrb[26].mxu1 %vm3081_vm5, %v4723_v36  ;;  %5201 = vmatprep.subr.mxu1 %v7579_v57  ;;  %v3799_v36 = vld [vmem:[#allocation5 + $0xf0] sm:$0xff] }
 0x52c   : > { %5202 = vmatpush3.msra.mxu1 %v2790_v12  ;;  %5203 = vmatprep.mubr.msk.f32.mxu1 %vm6434_vm0, %v7579_v57  ;;  %v3783_v12 = vld [vmem:[#allocation5 + $0x78] sm:$0xff] }
 0x52d   : > { %5206 = vmatprep.subr.mxu1 %v7579_v57 }
 0x52f   : > { %5204 = vmatmul.mubr.msk.f32.vlgmr.msra.gmra.mrb[28].mxu1 %vm3081_vm5, %v3078_v10 }
 0x530   : > { %5207 = vmatpush3.msra.mxu1 %v2861_v22  ;;  %5208 = vmatprep.mubr.msk.f32.mxu1 %vm6434_vm0, %v7579_v57  ;;  %v6058_v22 = vpack.c.bf16 %v3783_v12, %v3782_v61  ;;  %v3953_v61 = vld [vmem:[#allocation5 + $0x140] sm:$0xff]  ;;  %v3954_v12 = vld [vmem:[#allocation5 + $0x148] sm:$0xff] }
 0x531   : > { %5211 = vmatprep.subr.mxu1 %v7579_v57 }
 0x533   : > { %5209 = vmatmul.mubr.msk.f32.vlgmr.msra.gmra.mrb[30].mxu1 %vm3081_vm5, %v4726_v25 }
 0x534   : > { %5212 = vmatpush3.msra.mxu1 %v2863_v2  ;;  %5213 = vmatprep.mubr.msk.f32.mxu1 %vm6434_vm0, %v7579_v57  ;;  %v6034_v2 = vpack.c.bf16 %v3800_v44, %v3799_v36  ;;  %v4045_v36 = vld [vmem:[#allocation5 + $0x1d0] sm:$0xff]  ;;  %v4046_v44 = vld [vmem:[#allocation5 + $0x1d8] sm:$0xff] }
 0x535   : > { %5216 = vmatprep.subr.mxu1 %v7579_v57 }
 0x537   : > { %5214 = vmatmul.mubr.msk.f32.vlgmr.msra.gmra.mrb[32].mxu1 %vm3081_vm5, %v4728_v30 }
 0x538   : > { %5218 = vmatprep.mubr.msk.f32.mxu1 %vm6434_vm0, %v7579_v57 }
 0x548   : > { %v2932_v48 = vpop.f32.mrb[36].mxu0  ;;  %v3003_v31 = vpop.f32.mrb[24].mxu1 }
 0x549   : > { %v2934_v5 = vpop.f32.mrb[37].mxu0  ;;  %v3005_v40 = vpop.f32.mrb[25].mxu1  ;;  %5217 = vmatpush3.msra.mxu1 %v2932_v48 }
 0x54a   : > { %5219 = vmatmul.mubr.msk.f32.vlgmr.msra.gmra.mrb[34].mxu1 %vm3081_vm5, %v4730_v47  ;;  %5221 = vmatprep.subr.mxu1 %v7579_v57 }
 0x54b   : > { %5222 = vmatpush3.msra.mxu1 %v2934_v5  ;;  %5223 = vmatprep.mubr.msk.f32.mxu1 %vm6434_vm0, %v7579_v57 }
 0x54c   : > { %5226 = vmatprep.subr.mxu1 %v7579_v57 }
 0x54e   : > { %5224 = vmatmul.mubr.msk.f32.vlgmr.msra.gmra.mrb[36].mxu1 %vm3081_vm5, %v4732_v13 }
 0x54f   : > { %5227 = vmatpush3.msra.mxu1 %v3003_v31  ;;  %5228 = vmatprep.mubr.msk.f32.mxu1 %vm6434_vm0, %v7579_v57 }
 0x550   : > { %5231 = vmatprep.subr.mxu1 %v7579_v57 }
 0x552   : > { %5229 = vmatmul.mubr.msk.f32.vlgmr.msra.gmra.mrb[38].mxu1 %vm3081_vm5, %v4734_v0 }
 0x553   : > { %5232 = vmatpush3.msra.mxu1 %v3005_v40  ;;  %5233 = vmatprep.mubr.msk.f32.mxu1 %vm6434_vm0, %v7579_v57 }
 0x554   : > { %6012 = vmatprep.subr.bf16.mxu1 %v7596_v11 }
 0x556   : > { %5234 = vmatmul.mubr.msk.f32.vlgmr.msra.gmra.mrb[40].mxu1 %vm3081_vm5, %v4736_v41 }
 0x557   : > { %5273 = vmatprep.mubr.msk.f32.mxu1 %vm6434_vm0, %v7579_v57  ;;  %6014 = vmatpush3.bf16.msra.mxu1 %v6013_v23 }
 0x558   : > { %6015 = vmatprep.subr.bf16.mxu1 %v7596_v11 }
 0x55b   : > { %6017 = vmatpush3.bf16.msra.mxu1 %v6016_v58 }
 0x55c   : > { %6018 = vmatprep.subr.bf16.mxu1 %v7596_v11 }
 0x55f   : > { %6020 = vmatpush3.bf16.msra.mxu1 %v6019_v19 }
 0x560   : > { %6021 = vmatprep.subr.bf16.mxu1 %v7596_v11 }
 0x563   : > { %6023 = vmatpush3.bf16.msra.mxu1 %v6022_v27  ;;  %v3948_v27 = vld [vmem:[#allocation5 + $0x118] sm:$0xff] }
 0x564   : > { %6024 = vmatprep.subr.bf16.mxu1 %v7596_v11  ;;  %v6064_v38 = vpack.c.bf16 %v3948_v27, %v3947_v24  ;;  %v4131_v27 = vld [vmem:[#allocation5 + $0x230] sm:$0xff] }
 0x567   : > { %6026 = vmatpush3.bf16.msra.mxu1 %v6025_v42  ;;  %v3950_v42 = vld [vmem:[#allocation5 + $0x128] sm:$0xff] }
 0x568   : > { %v3074_v32 = vpop.f32.mrb[38].mxu0  ;;  %6027 = vmatprep.subr.bf16.mxu1 %v7596_v11  ;;  %v6067_v1 = vpack.c.bf16 %v3950_v42, %v3949_v37  ;;  %v4133_v42 = vld [vmem:[#allocation5 + $0x240] sm:$0xff] }
 0x569   : > { %v5195_v50 = vpop.f32.mrb[39].mxu0  ;;  %5237 = vmatpush3.msra.mxu0 %v3074_v32 }
 0x56a   : > { %5239 = vmatmul.mubr.msk.f32.vlgmr.msra.gmra.mrb[40].mxu0 %vm3081_vm5, %v4738_v49  ;;  %6036 = vmatprep.subr.bf16.mxu0 %v7596_v11 }
 0x56b   : > { %5308 = vmatprep.mubr.msk.f32.mxu0 %vm6434_vm0, %v7579_v57  ;;  %6038 = vmatpush3.bf16.msra.mxu0 %v6037_v3 }
 0x56c   : > { %6039 = vmatprep.subr.bf16.mxu0 %v7596_v11  ;;  %6029 = vmatpush3.bf16.msra.mxu1 %v6028_v18  ;;  %v3952_v18 = vld [vmem:[#allocation5 + $0x138] sm:$0xff] }
 0x56d   : > { %6030 = vmatprep.subr.bf16.mxu1 %v7596_v11 }
 0x56f   : > { %6041 = vmatpush3.bf16.msra.mxu0 %v6040_v39 }
 0x570   : > { %6042 = vmatprep.subr.bf16.mxu0 %v7596_v11  ;;  %6032 = vmatpush3.bf16.msra.mxu1 %v6031_v55  ;;  %v6070_v55 = vpack.c.bf16 %v3952_v18, %v3951_v7  ;;  %v4135_v18 = vld [vmem:[#allocation5 + $0x250] sm:$0xff] }
 0x571   : > { %6033 = vmatprep.subr.bf16.mxu1 %v7596_v11 }
 0x573   : > { %6044 = vmatpush3.bf16.msra.mxu0 %v6043_v46  ;;  %v4036_v46 = vld [vmem:[#allocation5 + $0x188] sm:$0xff] }
 0x574   : > { %6045 = vmatprep.subr.bf16.mxu0 %v7596_v11  ;;  %6035 = vmatpush3.bf16.msra.mxu1 %v6034_v2  ;;  %v6085_v19 = vpack.c.bf16 %v4036_v46, %v4035_v21  ;;  %v6073_v2 = vpack.c.bf16 %v3954_v12, %v3953_v61  ;;  %v4128_v21 = vld [vmem:[#allocation5 + $0x218] sm:$0xff]  ;;  %v4137_v12 = vld [vmem:[#allocation5 + $0x260] sm:$0xff] }
 0x575   : > { %6060 = vmatprep.subr.bf16.mxu1 %v7596_v11 }
 0x577   : > { %6047 = vmatpush3.bf16.msra.mxu0 %v6046_v14  ;;  %v6061_v14 = vpack.c.bf16 %v3946_v6, %v3945_v62  ;;  %v4220_v62 = vld [vmem:[#allocation5 + $0x2a8] sm:$0xff] }
 0x578   : > { %6048 = vmatprep.subr.bf16.mxu0 %v7596_v11 }
 0x57b   : > { %6050 = vmatpush3.bf16.msra.mxu0 %v6049_v28  ;;  %v6088_v28 = vpack.c.bf16 %v4038_v9, %v4037_v8  ;;  %v4130_v8 = vld [vmem:[#allocation5 + $0x228] sm:$0xff] }
 0x57c   : > { %6051 = vmatprep.subr.bf16.mxu0 %v7596_v11 }
 0x57f   : > { %6053 = vmatpush3.bf16.msra.mxu0 %v6052_v45  ;;  %v6091_v45 = vpack.c.bf16 %v4040_v34, %v4039_v29  ;;  %v4223_v34 = vld [vmem:[#allocation5 + $0x2c0] sm:$0xff] }
 0x580   : > { %6054 = vmatprep.subr.bf16.mxu0 %v7596_v11 }
 0x583   : > { %6056 = vmatpush3.bf16.msra.mxu0 %v6055_v59  ;;  %v6094_v59 = vpack.c.bf16 %v4042_v56, %v4041_v52  ;;  %v4225_v56 = vld [vmem:[#allocation5 + $0x2d0] sm:$0xff] }
 0x584   : > { %6057 = vmatprep.subr.bf16.mxu0 %v7596_v11 }
 0x587   : > { %6059 = vmatpush3.bf16.msra.mxu0 %v6058_v22  ;;  %v6097_v22 = vpack.c.bf16 %v4044_v26, %v4043_v51  ;;  %v4227_v26 = vld [vmem:[#allocation5 + $0x2e0] sm:$0xff] }
 0x588   : > { %6084 = vmatprep.subr.bf16.mxu0 %v7596_v11 }
 0x5fe   : > { %v3151_v10 = vpop.f32.mrb[26].mxu1 }
 0x5ff   : > { %v5200_v25 = vpop.f32.mrb[27].mxu1 }
 0x600   : > { %v3956_v25 = vld [vmem:[#allocation5 + $0x158] sm:$0xff] }
 0x602   : > { %v3224_v30 = vpop.f32.mrb[28].mxu1 }
 0x603   : > { %v3225_v47 = vadd.f32 %v3224_v30, %v3151_v10  ;;  %v5205_v48 = vpop.f32.mrb[29].mxu1  ;;  %v3955_v10 = vld [vmem:[#allocation5 + $0x150] sm:$0xff]  ;;  %v6100_v30 = vpack.c.bf16 %v4046_v44, %v4045_v36 }
 0x604   : > { %v4048_v48 = vld [vmem:[#allocation5 + $0x1e8] sm:$0xff]  ;;  %v4229_v44 = vld [vmem:[#allocation5 + $0x2f0] sm:$0xff] }
 0x606   : > { %v3299_v31 = vpop.f32.mrb[30].mxu1 }
 0x607   : > { %v3303_v5 = vadd.f32 %v3299_v31, %v3225_v47  ;;  %v5210_v40 = vpop.f32.mrb[31].mxu1  ;;  %v4047_v47 = vld [vmem:[#allocation5 + $0x1e0] sm:$0xff]  ;;  %v6076_v31 = vpack.c.bf16 %v3956_v25, %v3955_v10  ;;  %v4139_v25 = vld [vmem:[#allocation5 + $0x270] sm:$0xff] }
 0x608   : > { %v3958_v40 = vld [vmem:[#allocation5 + $0x168] sm:$0xff] }
 0x60a   : > { %v3375_v13 = vpop.f32.mrb[32].mxu1 }
 0x60b   : > { %v3379_v0 = vadd.f32 %v3375_v13, %v3303_v5  ;;  %v5215_v41 = vpop.f32.mrb[33].mxu1  ;;  %v3957_v5 = vld [vmem:[#allocation5 + $0x160] sm:$0xff]  ;;  %v6103_v13 = vpack.c.bf16 %v4048_v48, %v4047_v47 }
 0x60c   : > { %v4050_v41 = vld [vmem:[#allocation5 + $0x1f8] sm:$0xff]  ;;  %v4395_v48 = vld [vmem:[#allocation5 + $0x380] sm:$0xff] }
 0x61d   : > { %v3451_v49 = vpop.f32.mrb[34].mxu1 }
 0x61e   : > { %v3455_v32 = vadd.f32 %v3451_v49, %v3379_v0  ;;  %v5220_v50 = vpop.f32.mrb[35].mxu1  ;;  %v4049_v0 = vld [vmem:[#allocation5 + $0x1f0] sm:$0xff]  ;;  %v6079_v49 = vpack.c.bf16 %v3958_v40, %v3957_v5  ;;  %v4305_v40 = vld [vmem:[#allocation5 + $0x300] sm:$0xff] }
 0x61f   : > { %v3960_v50 = vld [vmem:[#allocation5 + $0x178] sm:$0xff] }
 0x621   : > { %v3527_v53 = vpop.f32.mrb[36].mxu1 }
 0x622   : > { %v3531_v63 = vadd.f32 %v3527_v53, %v3455_v32  ;;  %v5225_v3 = vpop.f32.mrb[37].mxu1  ;;  %v3959_v32 = vld [vmem:[#allocation5 + $0x170] sm:$0xff]  ;;  %v6106_v53 = vpack.c.bf16 %v4050_v41, %v4049_v0 }
 0x623   : > { %v4216_v3 = vld [vmem:[#allocation5 + $0x288] sm:$0xff] }
 0x625   : > { %v3603_v17 = vpop.f32.mrb[38].mxu1 }
 0x626   : > { %v3607_v20 = vadd.f32 %v3603_v17, %v3531_v63  ;;  %v5230_v23 = vpop.f32.mrb[39].mxu1  ;;  %v4215_v63 = vld [vmem:[#allocation5 + $0x280] sm:$0xff]  ;;  %v6082_v17 = vpack.c.bf16 %v3960_v50, %v3959_v32  ;;  %v4398_v32 = vld [vmem:[#allocation5 + $0x398] sm:$0xff] }
 0x627   : > { %v4126_v23 = vld [vmem:[#allocation5 + $0x208] sm:$0xff] }
 0x629   : > { %v3679_v33 = vpop.f32.mrb[40].mxu1 }
 0x62a   : > { %v3683_v35 = vadd.f32 %v3679_v33, %v3607_v20  ;;  %v5235_v39 = vpop.f32.mrb[41].mxu1  ;;  %v4125_v20 = vld [vmem:[#allocation5 + $0x200] sm:$0xff]  ;;  %v6133_v33 = vpack.c.bf16 %v4216_v3, %v4215_v63  ;;  %v4307_v63 = vld [vmem:[#allocation5 + $0x310] sm:$0xff]  ;;  %v4308_v3 = vld [vmem:[#allocation5 + $0x318] sm:$0xff] }
 0x62b   : > { %v4217_v39 = vld [vmem:[#allocation5 + $0x290] sm:$0xff] }
 0x63d   : > { %v3755_v43 = vpop.f32.mrb[40].mxu0 }
 0x63e   : > { %v3759_v58 = vadd.f32 %v3755_v43, %v3683_v35  ;;  %v5240_v16 = vpop.f32.mrb[41].mxu0  ;;  %v4218_v43 = vld [vmem:[#allocation5 + $0x298] sm:$0xff] }
 0x63f   : > { %v4127_v16 = vld [vmem:[#allocation5 + $0x210] sm:$0xff]  ;;  %v6136_v46 = vpack.c.bf16 %v4218_v43, %v4217_v39  ;;  %v4310_v39 = vld [vmem:[#allocation5 + $0x328] sm:$0xff] }
 0x640   : > { %v3766_v60 = vadd.f32 %v3764_v54, %v3759_v58  ;;  %v6109_v54 = vpack.c.bf16 %v4126_v23, %v4125_v20  ;;  %v6112_v6 = vpack.c.bf16 %v4128_v21, %v4127_v16  ;;  %v4399_v20 = vld [vmem:[#allocation5 + $0x3a0] sm:$0xff]  ;;  %v4400_v23 = vld [vmem:[#allocation5 + $0x3a8] sm:$0xff]  ;;  %v4311_v21 = vld [vmem:[#allocation5 + $0x330] sm:$0xff] }
 0x641   : > { %v6187_v43 = vpack.c.bf16 %v4400_v23, %v4399_v20 }
 0x642   : > { %v7279_v4 = vmax.f32 %v3766_v60, 0.0  ;;  %v4219_v60 = vld [vmem:[#allocation5 + $0x2a0] sm:$0xff] }
 0x643   : > { %v6139_v9 = vpack.c.bf16 %v4220_v62, %v4219_v60  ;;  %v4403_v62 = vld [vmem:[#allocation5 + $0x3c0] sm:$0xff] }
 0x644   : > { %5309 = vmatmul.mubr.f32.vlgmr.msra.gmra.mrb[42].mxu0 %v7279_v4  ;;  %v3802_v15 = vrot.slane %v7279_v4, 1  ;;  %v4051_v35 = vrot.slane %v7279_v4, 3  ;;  %v3961_v58 = vrot.slane %v7279_v4, 2  ;;  %v4231_v41 = vrot.slane %v7279_v4, 5 }
 0x645   : > { %6086 = vmatpush3.bf16.msra.mxu0 %v6085_v19  ;;  %5378 = vmatprep.mubr.msk.f32.mxu0 %vm6434_vm0, %v7579_v57  ;;  %v4129_v19 = vld [vmem:[#allocation5 + $0x220] sm:$0xff] }
 0x646   : > { %5274 = vmatmul.mubr.f32.vlgmr.msra.gmra.mrb[42].mxu1 %v3802_v15  ;;  %6087 = vmatprep.subr.bf16.mxu0 %v7596_v11  ;;  %v4222_v15 = vld [vmem:[#allocation5 + $0x2b8] sm:$0xff]  ;;  %v6115_v24 = vpack.c.bf16 %v4130_v8, %v4129_v19  ;;  %v4313_v8 = vld [vmem:[#allocation5 + $0x340] sm:$0xff] }
 0x647   : > { %6062 = vmatpush3.bf16.msra.mxu1 %v6061_v14  ;;  %5343 = vmatprep.mubr.msk.f32.mxu1 %vm6434_vm0, %v7579_v57  ;;  %v4221_v14 = vld [vmem:[#allocation5 + $0x2b0] sm:$0xff] }
 0x648   : > { %6063 = vmatprep.subr.bf16.mxu1 %v7596_v11  ;;  %v6142_v29 = vpack.c.bf16 %v4222_v15, %v4221_v14  ;;  %v4405_v15 = vld [vmem:[#allocation5 + $0x3d0] sm:$0xff] }
 0x649   : > { %6089 = vmatpush3.bf16.msra.mxu0 %v6088_v28  ;;  %v4132_v28 = vld [vmem:[#allocation5 + $0x238] sm:$0xff] }
 0x64a   : > { %6090 = vmatprep.subr.bf16.mxu0 %v7596_v11  ;;  %v6118_v37 = vpack.c.bf16 %v4132_v28, %v4131_v27  ;;  %v4315_v28 = vld [vmem:[#allocation5 + $0x350] sm:$0xff] }
 0x64b   : > { %6065 = vmatpush3.bf16.msra.mxu1 %v6064_v38  ;;  %v4224_v38 = vld [vmem:[#allocation5 + $0x2c8] sm:$0xff] }
 0x64c   : > { %6066 = vmatprep.subr.bf16.mxu1 %v7596_v11  ;;  %v6145_v52 = vpack.c.bf16 %v4224_v38, %v4223_v34  ;;  %v4407_v38 = vld [vmem:[#allocation5 + $0x3e0] sm:$0xff] }
 0x64d   : > { %6092 = vmatpush3.bf16.msra.mxu0 %v6091_v45  ;;  %v4134_v45 = vld [vmem:[#allocation5 + $0x248] sm:$0xff] }
 0x64e   : > { %6093 = vmatprep.subr.bf16.mxu0 %v7596_v11  ;;  %v6121_v7 = vpack.c.bf16 %v4134_v45, %v4133_v42  ;;  %v4317_v45 = vld [vmem:[#allocation5 + $0x360] sm:$0xff] }
 0x64f   : > { %6068 = vmatpush3.bf16.msra.mxu1 %v6067_v1  ;;  %v4226_v1 = vld [vmem:[#allocation5 + $0x2d8] sm:$0xff] }
 0x650   : > { %6069 = vmatprep.subr.bf16.mxu1 %v7596_v11  ;;  %v6148_v51 = vpack.c.bf16 %v4226_v1, %v4225_v56  ;;  %v4409_v1 = vld [vmem:[#allocation5 + $0x3f0] sm:$0xff] }
 0x651   : > { %6095 = vmatpush3.bf16.msra.mxu0 %v6094_v59  ;;  %v4136_v59 = vld [vmem:[#allocation5 + $0x258] sm:$0xff] }
 0x652   : > { %6096 = vmatprep.subr.bf16.mxu0 %v7596_v11  ;;  %v6124_v61 = vpack.c.bf16 %v4136_v59, %v4135_v18  ;;  %v4319_v59 = vld [vmem:[#allocation5 + $0x370] sm:$0xff] }
 0x653   : > { %6071 = vmatpush3.bf16.msra.mxu1 %v6070_v55  ;;  %v4228_v55 = vld [vmem:[#allocation5 + $0x2e8] sm:$0xff] }
 0x654   : > { %6072 = vmatprep.subr.bf16.mxu1 %v7596_v11  ;;  %v6151_v36 = vpack.c.bf16 %v4228_v55, %v4227_v26 }
 0x655   : > { %6098 = vmatpush3.bf16.msra.mxu0 %v6097_v22  ;;  %v4138_v22 = vld [vmem:[#allocation5 + $0x268] sm:$0xff] }
 0x656   : > { %6099 = vmatprep.subr.bf16.mxu0 %v7596_v11  ;;  %v6127_v10 = vpack.c.bf16 %v4138_v22, %v4137_v12  ;;  %v4321_v12 = vrot.slane %v7279_v4, 6  ;;  %v4487_v22 = vld [vmem:[%s7468_s10] sm:$0xff] }
 0x657   : > { %6074 = vmatpush3.bf16.msra.mxu1 %v6073_v2  ;;  %v4230_v2 = vld [vmem:[#allocation5 + $0x2f8] sm:$0xff] }
 0x658   : > { %6075 = vmatprep.subr.bf16.mxu1 %v7596_v11  ;;  %v6154_v47 = vpack.c.bf16 %v4230_v2, %v4229_v44  ;;  %v4489_v44 = vld [vmem:[%s7468_s10 + $0x10] sm:$0xff] }
 0x659   : > { %6101 = vmatpush3.bf16.msra.mxu0 %v6100_v30  ;;  %v4140_v30 = vld [vmem:[#allocation5 + $0x278] sm:$0xff] }
 0x65a   : > { %6102 = vmatprep.subr.bf16.mxu0 %v7596_v11  ;;  %v6130_v5 = vpack.c.bf16 %v4140_v30, %v4139_v25  ;;  %v4492_v25 = vld [vmem:[%s7468_s10 + $0x28] sm:$0xff] }
 0x65b   : > { %6077 = vmatpush3.bf16.msra.mxu1 %v6076_v31  ;;  %v4396_v31 = vld [vmem:[#allocation5 + $0x388] sm:$0xff] }
 0x65c   : > { %6078 = vmatprep.subr.bf16.mxu1 %v7596_v11  ;;  %v6181_v0 = vpack.c.bf16 %v4396_v31, %v4395_v48  ;;  %v4494_v48 = vld [vmem:[%s7468_s10 + $0x38] sm:$0xff] }
 0x65d   : > { %6104 = vmatpush3.bf16.msra.mxu0 %v6103_v13  ;;  %v4306_v13 = vld [vmem:[#allocation5 + $0x308] sm:$0xff] }
 0x65e   : > { %6105 = vmatprep.subr.bf16.mxu0 %v7596_v11  ;;  %v6157_v50 = vpack.c.bf16 %v4306_v13, %v4305_v40  ;;  %v4496_v40 = vld [vmem:[%s7468_s10 + $0x48] sm:$0xff] }
 0x65f   : > { %6080 = vmatpush3.bf16.msra.mxu1 %v6079_v49  ;;  %v4397_v49 = vld [vmem:[#allocation5 + $0x390] sm:$0xff] }
 0x660   : > { %6081 = vmatprep.subr.bf16.mxu1 %v7596_v11 }
 0x661   : > { %6107 = vmatpush3.bf16.msra.mxu0 %v6106_v53  ;;  %v4141_v53 = vrot.slane %v7279_v4, 4 }
 0x662   : > { %6132 = vmatprep.subr.bf16.mxu0 %v7596_v11 }
 0x663   : > { %6083 = vmatpush3.bf16.msra.mxu1 %v6082_v17  ;;  %v6184_v17 = vpack.c.bf16 %v4398_v32, %v4397_v49  ;;  %v4499_v32 = vld [vmem:[%s7468_s10 + $0x60] sm:$0xff] }
 0x664   : > { %5379 = vmatmul.mubr.f32.vlgmr.msra.gmra.mrb[44].mxu0 %v4051_v35  ;;  %6108 = vmatprep.subr.bf16.mxu1 %v7596_v11  ;;  %v4309_v35 = vld [vmem:[#allocation5 + $0x320] sm:$0xff] }
 0x665   : > { %6134 = vmatpush3.bf16.msra.mxu0 %v6133_v33  ;;  %5448 = vmatprep.mubr.msk.f32.mxu0 %vm6434_vm0, %v7579_v57  ;;  %v6160_v33 = vpack.c.bf16 %v4308_v3, %v4307_v63  ;;  %v6163_v16 = vpack.c.bf16 %v4310_v39, %v4309_v35  ;;  %v4501_v63 = vld [vmem:[%s7468_s10 + $0x70] sm:$0xff]  ;;  %v4502_v3 = vld [vmem:[%s7468_s10 + $0x78] sm:$0xff] }
 0x666   : > { %5344 = vmatmul.mubr.f32.vlgmr.msra.gmra.mrb[44].mxu1 %v3961_v58  ;;  %6135 = vmatprep.subr.bf16.mxu0 %v7596_v11  ;;  %v4402_v58 = vld [vmem:[#allocation5 + $0x3b8] sm:$0xff] }
 0x667   : > { %6110 = vmatpush3.bf16.msra.mxu1 %v6109_v54  ;;  %5413 = vmatprep.mubr.msk.f32.mxu1 %vm6434_vm0, %v7579_v57  ;;  %v4401_v54 = vld [vmem:[#allocation5 + $0x3b0] sm:$0xff] }
 0x668   : > { %6111 = vmatprep.subr.bf16.mxu1 %v7596_v11  ;;  %v6190_v60 = vpack.c.bf16 %v4402_v58, %v4401_v54 }
 0x669   : > { %6137 = vmatpush3.bf16.msra.mxu0 %v6136_v46  ;;  %v4312_v46 = vld [vmem:[#allocation5 + $0x338] sm:$0xff] }
 0x66a   : > { %6138 = vmatprep.subr.bf16.mxu0 %v7596_v11  ;;  %v6166_v19 = vpack.c.bf16 %v4312_v46, %v4311_v21 }
 0x66b   : > { %6113 = vmatpush3.bf16.msra.mxu1 %v6112_v6  ;;  %v4404_v6 = vld [vmem:[#allocation5 + $0x3c8] sm:$0xff] }
 0x66c   : > { %6114 = vmatprep.subr.bf16.mxu1 %v7596_v11  ;;  %v6193_v14 = vpack.c.bf16 %v4404_v6, %v4403_v62 }
 0x66d   : > { %6140 = vmatpush3.bf16.msra.mxu0 %v6139_v9  ;;  %v4314_v9 = vld [vmem:[#allocation5 + $0x348] sm:$0xff] }
 0x66e   : > { %6141 = vmatprep.subr.bf16.mxu0 %v7596_v11  ;;  %v6169_v27 = vpack.c.bf16 %v4314_v9, %v4313_v8 }
 0x66f   : > { %6116 = vmatpush3.bf16.msra.mxu1 %v6115_v24  ;;  %v4406_v24 = vld [vmem:[#allocation5 + $0x3d8] sm:$0xff] }
 0x670   : > { %6117 = vmatprep.subr.bf16.mxu1 %v7596_v11  ;;  %v6196_v34 = vpack.c.bf16 %v4406_v24, %v4405_v15 }
 0x671   : > { %6143 = vmatpush3.bf16.msra.mxu0 %v6142_v29  ;;  %v4316_v29 = vld [vmem:[#allocation5 + $0x358] sm:$0xff] }
 0x672   : > { %6144 = vmatprep.subr.bf16.mxu0 %v7596_v11  ;;  %v6172_v42 = vpack.c.bf16 %v4316_v29, %v4315_v28  ;;  %v4484_v28 = vld [vmem:[%s7467_s9] sm:$0x1] }
 0x673   : > { %6119 = vmatpush3.bf16.msra.mxu1 %v6118_v37  ;;  %v4408_v37 = vld [vmem:[#allocation5 + $0x3e8] sm:$0xff] }
 0x674   : > { %6120 = vmatprep.subr.bf16.mxu1 %v7596_v11  ;;  %v6199_v56 = vpack.c.bf16 %v4408_v37, %v4407_v38  ;;  %v4503_v37 = vld [vmem:[%s7469_s11] sm:$0x1] }
 0x675   : > { %6146 = vmatpush3.bf16.msra.mxu0 %v6145_v52  ;;  %v4318_v52 = vld [vmem:[#allocation5 + $0x368] sm:$0xff] }
 0x676   : > { %6147 = vmatprep.subr.bf16.mxu0 %v7596_v11  ;;  %v6175_v18 = vpack.c.bf16 %v4318_v52, %v4317_v45 }
 0x677   : > { %6122 = vmatpush3.bf16.msra.mxu1 %v6121_v7  ;;  %v4410_v7 = vld [vmem:[#allocation5 + $0x3f8] sm:$0xff] }
 0x678   : > { %6123 = vmatprep.subr.bf16.mxu1 %v7596_v11  ;;  %v6202_v26 = vpack.c.bf16 %v4410_v7, %v4409_v1 }
 0x679   : > { %6149 = vmatpush3.bf16.msra.mxu0 %v6148_v51  ;;  %v4320_v51 = vld [vmem:[#allocation5 + $0x378] sm:$0xff] }
 0x67a   : > { %6150 = vmatprep.subr.bf16.mxu0 %v7596_v11  ;;  %v6178_v55 = vpack.c.bf16 %v4320_v51, %v4319_v59 }
 0x67b   : > { %6125 = vmatpush3.bf16.msra.mxu1 %v6124_v61  ;;  %v4411_v61 = vrot.slane %v7279_v4, 7  ;;  %v4490_v4 = vld [vmem:[%s7468_s10 + $0x18] sm:$0xff] }
 0x67c   : > { %6126 = vmatprep.subr.bf16.mxu1 %v7596_v11 }
 0x67d   : > { %6152 = vmatpush3.bf16.msra.mxu0 %v6151_v36  ;;  %v4488_v36 = vld [vmem:[%s7468_s10 + $0x8] sm:$0xff] }
 0x67e   : > { %6153 = vmatprep.subr.bf16.mxu0 %v7596_v11  ;;  %v6205_v2 = vpack.c.bf16 %v4488_v36, %v4487_v22 }
 0x67f   : > { %6128 = vmatpush3.bf16.msra.mxu1 %v6127_v10  ;;  %v6208_v10 = vpack.c.bf16 %v4490_v4, %v4489_v44 }
 0x680   : > { %6129 = vmatprep.subr.bf16.mxu1 %v7596_v11 }
 0x681   : > { %6155 = vmatpush3.bf16.msra.mxu0 %v6154_v47  ;;  %v4493_v47 = vld [vmem:[%s7468_s10 + $0x30] sm:$0xff] }
 0x682   : > { %6180 = vmatprep.subr.bf16.mxu0 %v7596_v11  ;;  %v6214_v31 = vpack.c.bf16 %v4494_v48, %v4493_v47 }
 0x683   : > { %6131 = vmatpush3.bf16.msra.mxu1 %v6130_v5  ;;  %v4495_v5 = vld [vmem:[%s7468_s10 + $0x40] sm:$0xff] }
 0x684   : > { %5449 = vmatmul.mubr.f32.vlgmr.msra.gmra.mrb[46].mxu0 %v4231_v41  ;;  %6156 = vmatprep.subr.bf16.mxu1 %v7596_v11  ;;  %v6217_v13 = vpack.c.bf16 %v4496_v40, %v4495_v5  ;;  %v4498_v41 = vld [vmem:[%s7468_s10 + $0x58] sm:$0xff] }
 0x685   : > { %6182 = vmatpush3.bf16.msra.mxu0 %v6181_v0  ;;  %5518 = vmatprep.mubr.msk.f32.mxu0 %vm6434_vm0, %v7579_v57  ;;  %v4497_v0 = vld [vmem:[%s7468_s10 + $0x50] sm:$0xff] }
 0x686   : > { %5414 = vmatmul.mubr.f32.vlgmr.msra.gmra.mrb[46].mxu1 %v4141_v53  ;;  %6183 = vmatprep.subr.bf16.mxu0 %v7596_v11  ;;  %v6220_v49 = vpack.c.bf16 %v4498_v41, %v4497_v0 }
 0x687   : > { %6158 = vmatpush3.bf16.msra.mxu1 %v6157_v50  ;;  %5483 = vmatprep.mubr.msk.f32.mxu1 %vm6434_vm0, %v7579_v57  ;;  %v4500_v50 = vld [vmem:[%s7468_s10 + $0x68] sm:$0xff] }
 0x688   : > { %6159 = vmatprep.subr.bf16.mxu1 %v7596_v11  ;;  %v6223_v53 = vpack.c.bf16 %v4500_v50, %v4499_v32 }
 0x689   : > { %6185 = vmatpush3.bf16.msra.mxu0 %v6184_v17  ;;  %v6226_v17 = vpack.c.bf16 %v4502_v3, %v4501_v63 }
 0x68a   : > { %6186 = vmatprep.subr.bf16.mxu0 %v7596_v11 }
 0x68b   : > { %6161 = vmatpush3.bf16.msra.mxu1 %v6160_v33 }
 0x68c   : > { %6162 = vmatprep.subr.bf16.mxu1 %v7596_v11 }
 0x68d   : > { %6188 = vmatpush3.bf16.msra.mxu0 %v6187_v43 }
 0x68e   : > { %6189 = vmatprep.subr.bf16.mxu0 %v7596_v11 }
 0x68f   : > { %6164 = vmatpush3.bf16.msra.mxu1 %v6163_v16 }
 0x690   : > { %6165 = vmatprep.subr.bf16.mxu1 %v7596_v11 }
 0x691   : > { %6191 = vmatpush3.bf16.msra.mxu0 %v6190_v60 }
 0x692   : > { %6192 = vmatprep.subr.bf16.mxu0 %v7596_v11 }
 0x693   : > { %6167 = vmatpush3.bf16.msra.mxu1 %v6166_v19 }
 0x694   : > { %6168 = vmatprep.subr.bf16.mxu1 %v7596_v11 }
 0x695   : > { %6194 = vmatpush3.bf16.msra.mxu0 %v6193_v14 }
 0x696   : > { %6195 = vmatprep.subr.bf16.mxu0 %v7596_v11 }
 0x697   : > { %6170 = vmatpush3.bf16.msra.mxu1 %v6169_v27 }
 0x698   : > { %6171 = vmatprep.subr.bf16.mxu1 %v7596_v11 }
 0x699   : > { %6197 = vmatpush3.bf16.msra.mxu0 %v6196_v34 }
 0x69a   : > { %6198 = vmatprep.subr.bf16.mxu0 %v7596_v11 }
 0x69b   : > { %6173 = vmatpush3.bf16.msra.mxu1 %v6172_v42 }
 0x69c   : > { %6174 = vmatprep.subr.bf16.mxu1 %v7596_v11 }
 0x69d   : > { %6200 = vmatpush3.bf16.msra.mxu0 %v6199_v56 }
 0x69e   : > { %6201 = vmatprep.subr.bf16.mxu0 %v7596_v11 }
 0x69f   : > { %6176 = vmatpush3.bf16.msra.mxu1 %v6175_v18 }
 0x6a0   : > { %6177 = vmatprep.subr.bf16.mxu1 %v7596_v11 }
 0x6a1   : > { %6203 = vmatpush3.bf16.msra.mxu0 %v6202_v26 }
 0x6a3   : > { %6179 = vmatpush3.bf16.msra.mxu1 %v6178_v55 }
 0x6a4   : > { %5519 = vmatmul.mubr.f32.vlgmr.msra.gmra.mrb[48].mxu0 %v4411_v61  ;;  %6204 = vmatprep.subr.bf16.mxu1 %v7596_v11 }
 0x6a6   : > { %5484 = vmatmul.mubr.f32.vlgmr.msra.gmra.mrb[48].mxu1 %v4321_v12 }
 0x6a7   : > { %5553 = vmatprep.mubr.msk.f32.mxu1 %vm6434_vm0, %v7579_v57  ;;  %6206 = vmatpush3.bf16.msra.mxu1 %v6205_v2  ;;  %v4491_v57 = vld [vmem:[%s7468_s10 + $0x20] sm:$0xff] }
 0x6a8   : > { %6207 = vmatprep.subr.bf16.mxu1 %v7596_v11  ;;  %v6211_v30 = vpack.c.bf16 %v4492_v25, %v4491_v57 }
 0x6ab   : > { %6209 = vmatpush3.bf16.msra.mxu1 %v6208_v10 }
 0x6ac   : > { %6210 = vmatprep.subr.bf16.mxu1 %v7596_v11 }
 0x6af   : > { %6212 = vmatpush3.bf16.msra.mxu1 %v6211_v30 }
 0x6b0   : > { %6213 = vmatprep.subr.bf16.mxu1 %v7596_v11 }
 0x6b3   : > { %6215 = vmatpush3.bf16.msra.mxu1 %v6214_v31 }
 0x6b4   : > { %6216 = vmatprep.subr.bf16.mxu1 %v7596_v11 }
 0x6b7   : > { %6218 = vmatpush3.bf16.msra.mxu1 %v6217_v13 }
 0x6b8   : > { %6219 = vmatprep.subr.bf16.mxu1 %v7596_v11 }
 0x6bb   : > { %6221 = vmatpush3.bf16.msra.mxu1 %v6220_v49 }
 0x6bc   : > { %6222 = vmatprep.subr.bf16.mxu1 %v7596_v11 }
 0x6bf   : > { %6224 = vmatpush3.bf16.msra.mxu1 %v6223_v53 }
 0x6c0   : > { %6225 = vmatprep.subr.bf16.mxu1 %v7596_v11 }
 0x6c3   : > { %6227 = vmatpush3.bf16.msra.mxu1 %v6226_v17 }
 0x717   : > { %v3940_v20 = vpop.f32.mrb[42].mxu0 }
 0x718   : > { %v5310_v23 = vpop.f32.mrb[43].mxu0 }
 0x719   : > { %v3870_v33 = vpop.f32.mrb[42].mxu1 }
 0x71a   : > { %v3941_v35 = vadd.f32 %v3940_v20, %v3870_v33  ;;  %v5275_v39 = vpop.f32.mrb[43].mxu1 }
 0x737   : > { %v4119_v43 = vpop.f32.mrb[44].mxu0 }
 0x738   : > { %v5380_v54 = vpop.f32.mrb[45].mxu0 }
 0x739   : > { %v4029_v58 = vpop.f32.mrb[44].mxu1 }
 0x73a   : > { %v4033_v16 = vadd.f32 %v4029_v58, %v3941_v35  ;;  %v5345_v11 = vpop.f32.mrb[45].mxu1 }
 0x73c   : > { %v4123_v21 = vadd.f32 %v4119_v43, %v4033_v16 }
 0x757   : > { %v4299_v46 = vpop.f32.mrb[46].mxu0 }
 0x758   : > { %v5450_v60 = vpop.f32.mrb[47].mxu0 }
 0x759   : > { %v4209_v62 = vpop.f32.mrb[46].mxu1 }
 0x75a   : > { %v4213_v6 = vadd.f32 %v4209_v62, %v4123_v21  ;;  %v5415_v19 = vpop.f32.mrb[47].mxu1 }
 0x75c   : > { %v4303_v8 = vadd.f32 %v4299_v46, %v4213_v6 }
 0x777   : > { %v4479_v9 = vpop.f32.mrb[48].mxu0 }
 0x778   : > { %v5520_v14 = vpop.f32.mrb[49].mxu0 }
 0x779   : > { %v4389_v15 = vpop.f32.mrb[48].mxu1 }
 0x77a   : > { %v4393_v24 = vadd.f32 %v4389_v15, %v4303_v8  ;;  %v5485_v27 = vpop.f32.mrb[49].mxu1 }
 0x77c   : > { %v4483_v29 = vadd.f32 %v4479_v9, %v4393_v24 }
 0x77e   : > { %v4485_v34 = vadd.f32 %v4484_v28, %v4483_v29 }
 0x780   : > { %v4486_v38 = vmax.f32 %v4485_v34, 0.0 }
 0x782   : > { %5554 = vmatmul.mubr.f32.vlgmr.msra.gmra.mrb[50].mxu1 %v4486_v38 }
 0x855   : > { %v4570_v42 = vpop.f32.mrb[50].mxu1 }
 0x856   : > { %v4571_v45 = vadd.f32 %v4570_v42, %v4503_v37  ;;  %v5555_v52 = vpop.f32.mrb[51].mxu1 }
 0x858   : > { %4575 = vst.msk [vmem:[%s431_s24] sm:$0x1] %vm4574_vm6, %v4571_v45 }
 0x859   : > { %6367 = shalt.err (!%p6364_p11)
}
 0x85a   : > { %s6368_s28 = scalar_lea.hbm %s7416_s18, 16  ;;  %s6372_s19 = scalar_lea.hbm %s7470_s12, 32 }
 0x85b   : > { %p6369_p13 = scmp.ne.s32.totalorder %s7416_s18, %s6368_s28  ;;  %p6373_p6 = scmp.lt.u32.totalorder %s7416_s18, %s7470_s12 }
 0x85c   : > { %p6374_p9 = scmp.lt.u32.totalorder %s6372_s19, %s6368_s28  ;;  %p6376_p10 = scmp.lt.u32.totalorder %s6368_s28, %s7416_s18 }
 0x85d   : > { %p6370_p0 = pnand %p6369_p13, %p7617_p1 }
 0x85e   : > { %p6375_p12 = por %p6374_p9, %p6373_p6 }
 0x85f   : > { %p6371_p5 = pneg %p6370_p0 }
 0x860   : > { %p6377_p2 = por %p6376_p10, %p6375_p12 }
 0x862   : > { %p6378_p3 = pnand %p6377_p2, %p6371_p5 }
 0x864   : > { %6381 = shalt.err (!%p6378_p3)
}
 0x865   : > { %6236 = dma.vmem_to_hbm [thread:$0]  (%p7617_p1), %s7418_s14, 16, %s7416_s18, %s4577_s20  }
 0x866 PF: > { %s7618_s24 = sld [smem:[#allocation13_spill]]  ;;  %s7619_s30 = sld [smem:[#allocation11_spill]] }
 0x867   : > { %s7620_s15 = sld [smem:[#allocation16_spill]] }
 0x86c   : > { %p6253_p4 = scmp.ge.s32.totalorder %s7618_s24, 2  ;;  %s4601_s26 = sand.u32 1, %s7619_s30  }
 0x86d   : > { %p7621_p7 = scmp.ne.s32.totalorder %s7620_s15, 0  ;;  %s4602_s25 = scalar_lea.sflag [#allocation4], %s4601_s26 }
 0x86f   : > { %p6246_p8 = pnand %p6253_p4, %p7621_p7 }
 0x871   : > { %6407 = dma.done.wait (!%p6246_p8), %s4602_s25, 16  }
 0x872   : > { %6409 = vsyncadd (!%p6246_p8), %s4602_s25, 4294967280  ;;  %s7622_s24 = sld [smem:[#allocation14_spill]]  ;;  %s7623_s23 = sld [smem:[#allocation12_spill]] }
 0x873   : > { %s7624_s27 = sld [smem:[#allocation15_spill]]  ;;  %s7625_s21 = smov %s6416_s22 }
 0x878   : > { %p24_p11 = scmp.ge.s32.totalorder %s7622_s24, 4   ;;  %s7626_s22 = smov %s7623_s23 }
 0x879   : > { %s7627_s23 = smov %s7624_s27 }
 0x87a   :  { %26 = sbr.rel (!%p24_p11) target bundleno = 5 (0x5), region = 143 }
 0x881   :  { %4606 = vsyncpa [#allocation3], 1 }
 0x882   :  { %4608 = vsyncpa [#allocation3 + $0x1], 1 }
 0x883   :  { %4609 = vsyncpa [#allocation6], 1 }
 0x884   :  { %4610 = vsyncpa [#allocation4], 1 }
 0x885   :  { %4612 = vsyncpa [#allocation4 + $0x1], 1 }

</bundles_post_ra>
